<compile_context>
chip_gen: v6e
topology: v6e:2x2x1
jax: 0.10.0
libtpu: 0.0.40
codegen_flags: <defaults>
</compile_context>

<pallas_src>
import jax
import jax.numpy as jnp
import numpy as np
from jax import lax
from jax.experimental import pallas as pl
from jax.experimental.pallas import tpu as pltpu

IN_CH = 3          # INPUT_SENSOR_CHANNELS
OUT_CH = 150       # OUTPUT_SENSOR_CHANNELS
C1, K1 = 32, 24
C2, K2 = 64, 16
C3, K3 = 96, 8
LANES = 128
BLOCK_N = 8        # samples per grid step (clamped to N)


def tpn_kernel(x_ref, w1_ref, b1_ref, w2_ref, b2_ref, w3_ref, b3_ref,
               wl_ref, bl_ref, o_ref):
    # x_ref block: (B, L1, 128) = layer-1 im2col'd input (zero-padded 72 -> 128 lanes).
    B, L1, _ = x_ref.shape
    L2 = L1 - K2 + 1
    L3 = L2 - K3 + 1

    # Load weights once per grid step; shared across the B samples in the block.
    w1 = w1_ref[...]; b1 = b1_ref[...]          # (128, 32),  (1, 32)
    w2 = w2_ref[...]; b2 = b2_ref[...]          # (512, 64),  (1, 64)
    w3 = w3_ref[...]; b3 = b3_ref[...]          # (512, 128), (1, 128)  (cols 96: are zero)
    wl = wl_ref[...]; bl = bl_ref[...]          # (150, 1),   (150, 1)

    for b in range(B):                           # static unroll; B is small
        # conv1 + ReLU: single matmul, contraction 128 (padded from 72)
        h1 = jnp.maximum(
            jnp.dot(x_ref[b], w1, preferred_element_type=jnp.float32) + b1, 0.0)      # (L1, 32)

        # conv2 + ReLU: in-kernel im2col -> single matmul, contraction 512
        a2 = jnp.concatenate([h1[k:k + L2, :] for k in range(K2)], axis=-1)           # (L2, 512)
        h2 = jnp.maximum(
            jnp.dot(a2, w2, preferred_element_type=jnp.float32) + b2, 0.0)            # (L2, 64)

        # conv3 + ReLU: im2col -> single matmul, contraction 512, 128-lane output
        a3 = jnp.concatenate([h2[k:k + L3, :] for k in range(K3)], axis=-1)           # (L3, 512)
        h3 = jnp.maximum(
            jnp.dot(a3, w3, preferred_element_type=jnp.float32) + b3, 0.0)            # (L3, 128)

        # AdaptiveMaxPool1d(1): global max over time (padded cols are all zeros)
        m = jnp.max(h3, axis=0, keepdims=True)                                        # (1, 128)

        # Linear(1, 150) + ReLU + permute(0, 2, 1): out[j, c] = relu(m[c]*W[j,0] + b[j])
        out = jnp.maximum(wl * m + bl, 0.0)                                           # (150, 128)
        o_ref[b] = out.astype(o_ref.dtype)


def init_params(key):
    """Deterministic synthetic params, PyTorch-native layouts."""
    ks = jax.random.split(key, 8)

    def u(k, shape, fan_in):
        bound = 1.0 / np.sqrt(fan_in)
        return jax.random.uniform(k, shape, jnp.float32, -bound, bound)

    w1 = u(ks[0], (C1, IN_CH, K1), IN_CH * K1); b1 = u(ks[1], (C1,), IN_CH * K1)
    w2 = u(ks[2], (C2, C1, K2), C1 * K2);       b2 = u(ks[3], (C2,), C1 * K2)
    w3 = u(ks[4], (C3, C2, K3), C2 * K3);       b3 = u(ks[5], (C3,), C2 * K3)
    wl = u(ks[6], (OUT_CH, 1), 1);              bl = u(ks[7], (OUT_CH,), 1)
    return (w1, b1, w2, b2, w3, b3, wl, bl)


def tpn_forward_pallas(x_ncl, params):
    w1, b1, w2, b2, w3, b3, wl, bl = params
    x = jnp.transpose(x_ncl, (0, 2, 1)).astype(jnp.float32)      # (N, L, Cin)
    N, L, Cin = x.shape
    L1 = L - K1 + 1                                              # requires L >= 46

    # ---- host-side layer-1 im2col, zero padded to 128 lanes ----
    KC1 = K1 * Cin                                               # 72
    xcol = jnp.concatenate([x[:, k:k + L1, :] for k in range(K1)], axis=-1)   # (N, L1, 72)
    xcol = jnp.pad(xcol, ((0, 0), (0, 0), (0, LANES - KC1)))                  # (N, L1, 128)

    # ---- host-side 2D weight reshapes (K*Cin, Cout), layer-1 rows / layer-3 cols padded ----
    w1_2d = jnp.pad(jnp.transpose(w1, (2, 1, 0)).reshape(KC1, C1),
                    ((0, LANES - KC1), (0, 0)))                               # (128, 32)
    w2_2d = jnp.transpose(w2, (2, 1, 0)).reshape(K2 * C1, C2)                 # (512, 64)
    w3_2d = jnp.pad(jnp.transpose(w3, (2, 1, 0)).reshape(K3 * C2, C3),
                    ((0, 0), (0, LANES - C3)))                                # (512, 128)
    b3_pad = jnp.pad(b3, (0, LANES - C3))                                     # (128,)

    # ---- batch B samples per grid step ----
    B = max(1, min(BLOCK_N, N))
    Npad = ((N + B - 1) // B) * B
    if Npad != N:
        xcol = jnp.pad(xcol, ((0, Npad - N), (0, 0), (0, 0)))

    operands = (
        xcol,
        w1_2d, b1.reshape(1, C1),
        w2_2d, b2.reshape(1, C2),
        w3_2d, b3_pad.reshape(1, LANES),
        wl.reshape(OUT_CH, 1), bl.reshape(OUT_CH, 1),
    )

    in_specs = [pl.BlockSpec((B, L1, LANES), lambda n: (n, 0, 0))]
    for op in operands[1:]:
        in_specs.append(pl.BlockSpec(op.shape, lambda n, nd=op.ndim: (0,) * nd))

    out = pl.pallas_call(
        tpn_kernel,
        out_shape=jax.ShapeDtypeStruct((Npad, OUT_CH, LANES), jnp.float32),
        grid_spec=pltpu.PrefetchScalarGridSpec(
            num_scalar_prefetch=0,
            grid=(Npad // B,),
            in_specs=in_specs,
            out_specs=pl.BlockSpec((B, OUT_CH, LANES), lambda n: (n, 0, 0)),
        ),
        compiler_params=pltpu.CompilerParams(
            dimension_semantics=("parallel",)),
    )(*operands)

    return [out[:N, :, :C3]]   # mirrors the `features` list in the PyTorch forward


def tpn_forward_reference(x_ncl, params):
    """Pure-JAX reference replicating the PyTorch math (eval mode)."""
    w1, b1, w2, b2, w3, b3, wl, bl = params
    dn = ('NCH', 'OIH', 'NCH')

    def conv(x, w, b):
        y = lax.conv_general_dilated(x, w, window_strides=(1,),
                                     padding='VALID', dimension_numbers=dn)
        return jax.nn.relu(y + b[None, :, None])

    h = conv(x_ncl.astype(jnp.float32), w1, b1)
    h = conv(h, w2, b2)
    h = conv(h, w3, b3)
    m = jnp.max(h, axis=2, keepdims=True)                # (N, 96, 1)
    y = jax.nn.relu(m @ wl.T + bl)                        # (N, 96, 150)
    return jnp.transpose(y, (0, 2, 1))                    # (N, 150, 96)


if __name__ == "__main__":
    key = jax.random.PRNGKey(0)
    pkey, xkey = jax.random.split(key)
    params = init_params(pkey)

    N, L = 2, 64                                          # L >= 46 required by the convs
    x = jax.random.normal(xkey, (N, IN_CH, L), jnp.float32)

    out = tpn_forward_pallas(x, params)[0]
    out = jax.block_until_ready(out)

    ref = jax.block_until_ready(tpn_forward_reference(x, params))
    np.testing.assert_allclose(np.asarray(out), np.asarray(ref),
                               atol=1e-4, rtol=1e-4)
    assert out.shape == (N, OUT_CH, C3) and out.dtype == jnp.float32
    print("KERNEL_OK")
</pallas_src>

<mosaic_0001>
module attributes {stable_mosaic.version = 11 : i64} {
  func.func @tpn_kernel(%arg0: i32, %arg1: memref<2x41x128xf32, #tpu.memory_space<vmem>>, %arg2: memref<128x32xf32, #tpu.memory_space<vmem>>, %arg3: memref<1x32xf32, #tpu.memory_space<vmem>>, %arg4: memref<512x64xf32, #tpu.memory_space<vmem>>, %arg5: memref<1x64xf32, #tpu.memory_space<vmem>>, %arg6: memref<512x128xf32, #tpu.memory_space<vmem>>, %arg7: memref<1x128xf32, #tpu.memory_space<vmem>>, %arg8: memref<150x1xf32, #tpu.memory_space<vmem>>, %arg9: memref<150x1xf32, #tpu.memory_space<vmem>>, %arg10: memref<2x150x128xf32, #tpu.memory_space<vmem>>) attributes {dimension_semantics = [#tpu.dimension_semantics<parallel>], iteration_bounds = array<i64: 1>, scalar_prefetch = 0 : i64, scratch_operands = 0 : i64, tpu.core_type = #tpu.core_type<tc>, window_params = [{transform_indices = @transform_0, window_bounds = array<i64: 2, 41, 128>}, {pipeline_mode = #tpu.pipeline_mode<synchronous>, transform_indices = @transform_1, window_bounds = array<i64: 128, 32>}, {pipeline_mode = #tpu.pipeline_mode<synchronous>, transform_indices = @transform_2, window_bounds = array<i64: 1, 32>}, {pipeline_mode = #tpu.pipeline_mode<synchronous>, transform_indices = @transform_3, window_bounds = array<i64: 512, 64>}, {pipeline_mode = #tpu.pipeline_mode<synchronous>, transform_indices = @transform_4, window_bounds = array<i64: 1, 64>}, {pipeline_mode = #tpu.pipeline_mode<synchronous>, transform_indices = @transform_5, window_bounds = array<i64: 512, 128>}, {pipeline_mode = #tpu.pipeline_mode<synchronous>, transform_indices = @transform_6, window_bounds = array<i64: 1, 128>}, {pipeline_mode = #tpu.pipeline_mode<synchronous>, transform_indices = @transform_7, window_bounds = array<i64: 150, 1>}, {pipeline_mode = #tpu.pipeline_mode<synchronous>, transform_indices = @transform_8, window_bounds = array<i64: 150, 1>}, {transform_indices = @transform_9, window_bounds = array<i64: 2, 150, 128>}]} {
    %c0 = arith.constant 0 : index
    %c0_0 = arith.constant 0 : index
    %0 = vector.load %arg2[%c0, %c0_0] : memref<128x32xf32, #tpu.memory_space<vmem>>, vector<128x32xf32>
    %c0_1 = arith.constant 0 : index
    %c0_2 = arith.constant 0 : index
    %1 = vector.load %arg3[%c0_1, %c0_2] : memref<1x32xf32, #tpu.memory_space<vmem>>, vector<1x32xf32>
    %c0_3 = arith.constant 0 : index
    %c0_4 = arith.constant 0 : index
    %2 = vector.load %arg4[%c0_3, %c0_4] : memref<512x64xf32, #tpu.memory_space<vmem>>, vector<512x64xf32>
    %c0_5 = arith.constant 0 : index
    %c0_6 = arith.constant 0 : index
    %3 = vector.load %arg5[%c0_5, %c0_6] : memref<1x64xf32, #tpu.memory_space<vmem>>, vector<1x64xf32>
    %c0_7 = arith.constant 0 : index
    %c0_8 = arith.constant 0 : index
    %4 = vector.load %arg6[%c0_7, %c0_8] : memref<512x128xf32, #tpu.memory_space<vmem>>, vector<512x128xf32>
    %c0_9 = arith.constant 0 : index
    %c0_10 = arith.constant 0 : index
    %5 = vector.load %arg7[%c0_9, %c0_10] : memref<1x128xf32, #tpu.memory_space<vmem>>, vector<1x128xf32>
    %c0_11 = arith.constant 0 : index
    %c0_12 = arith.constant 0 : index
    %6 = vector.load %arg8[%c0_11, %c0_12] : memref<150x1xf32, #tpu.memory_space<vmem>>, vector<150x1xf32>
    %c0_13 = arith.constant 0 : index
    %c0_14 = arith.constant 0 : index
    %7 = vector.load %arg9[%c0_13, %c0_14] : memref<150x1xf32, #tpu.memory_space<vmem>>, vector<150x1xf32>
    %c0_15 = arith.constant 0 : index
    %c0_16 = arith.constant 0 : index
    %c0_17 = arith.constant 0 : index
    %8 = vector.load %arg1[%c0_15, %c0_16, %c0_17] : memref<2x41x128xf32, #tpu.memory_space<vmem>>, vector<1x41x128xf32>
    %9 = vector.shape_cast %8 : vector<1x41x128xf32> to vector<41x128xf32>
    %cst = arith.constant dense<0.000000e+00> : vector<41x32xf32>
    %10 = tpu.matmul %9, %0, %cst {dimension_numbers = #tpu.dot_dimension_numbers<[1], [0], [0], [1], [0, 0, 1, 1], [], []>} : vector<41x128xf32>, vector<128x32xf32>, vector<41x32xf32> -> vector<41x32xf32>
    %11 = vector.broadcast %1 : vector<1x32xf32> to vector<41x32xf32>
    %12 = arith.addf %10, %11 : vector<41x32xf32>
    %cst_18 = arith.constant 0.000000e+00 : f32
    %13 = vector.broadcast %cst_18 : f32 to vector<41x32xf32>
    %14 = arith.maximumf %12, %13 : vector<41x32xf32>
    %15 = vector.extract_strided_slice %14 {offsets = [0, 0], sizes = [26, 32], strides = [1, 1]} : vector<41x32xf32> to vector<26x32xf32>
    %16 = vector.extract_strided_slice %14 {offsets = [1, 0], sizes = [26, 32], strides = [1, 1]} : vector<41x32xf32> to vector<26x32xf32>
    %17 = vector.extract_strided_slice %14 {offsets = [2, 0], sizes = [26, 32], strides = [1, 1]} : vector<41x32xf32> to vector<26x32xf32>
    %18 = vector.extract_strided_slice %14 {offsets = [3, 0], sizes = [26, 32], strides = [1, 1]} : vector<41x32xf32> to vector<26x32xf32>
    %19 = vector.extract_strided_slice %14 {offsets = [4, 0], sizes = [26, 32], strides = [1, 1]} : vector<41x32xf32> to vector<26x32xf32>
    %20 = vector.extract_strided_slice %14 {offsets = [5, 0], sizes = [26, 32], strides = [1, 1]} : vector<41x32xf32> to vector<26x32xf32>
    %21 = vector.extract_strided_slice %14 {offsets = [6, 0], sizes = [26, 32], strides = [1, 1]} : vector<41x32xf32> to vector<26x32xf32>
    %22 = vector.extract_strided_slice %14 {offsets = [7, 0], sizes = [26, 32], strides = [1, 1]} : vector<41x32xf32> to vector<26x32xf32>
    %23 = vector.extract_strided_slice %14 {offsets = [8, 0], sizes = [26, 32], strides = [1, 1]} : vector<41x32xf32> to vector<26x32xf32>
    %24 = vector.extract_strided_slice %14 {offsets = [9, 0], sizes = [26, 32], strides = [1, 1]} : vector<41x32xf32> to vector<26x32xf32>
    %25 = vector.extract_strided_slice %14 {offsets = [10, 0], sizes = [26, 32], strides = [1, 1]} : vector<41x32xf32> to vector<26x32xf32>
    %26 = vector.extract_strided_slice %14 {offsets = [11, 0], sizes = [26, 32], strides = [1, 1]} : vector<41x32xf32> to vector<26x32xf32>
    %27 = vector.extract_strided_slice %14 {offsets = [12, 0], sizes = [26, 32], strides = [1, 1]} : vector<41x32xf32> to vector<26x32xf32>
    %28 = vector.extract_strided_slice %14 {offsets = [13, 0], sizes = [26, 32], strides = [1, 1]} : vector<41x32xf32> to vector<26x32xf32>
    %29 = vector.extract_strided_slice %14 {offsets = [14, 0], sizes = [26, 32], strides = [1, 1]} : vector<41x32xf32> to vector<26x32xf32>
    %30 = vector.extract_strided_slice %14 {offsets = [15, 0], sizes = [26, 32], strides = [1, 1]} : vector<41x32xf32> to vector<26x32xf32>
    %31 = tpu.concatenate %15, %16, %17, %18, %19, %20, %21, %22, %23, %24, %25, %26, %27, %28, %29, %30 in 1 : vector<26x32xf32>, vector<26x32xf32>, vector<26x32xf32>, vector<26x32xf32>, vector<26x32xf32>, vector<26x32xf32>, vector<26x32xf32>, vector<26x32xf32>, vector<26x32xf32>, vector<26x32xf32>, vector<26x32xf32>, vector<26x32xf32>, vector<26x32xf32>, vector<26x32xf32>, vector<26x32xf32>, vector<26x32xf32> -> vector<26x512xf32>
    %cst_19 = arith.constant dense<0.000000e+00> : vector<26x64xf32>
    %32 = tpu.matmul %31, %2, %cst_19 {dimension_numbers = #tpu.dot_dimension_numbers<[1], [0], [0], [1], [0, 0, 1, 1], [], []>} : vector<26x512xf32>, vector<512x64xf32>, vector<26x64xf32> -> vector<26x64xf32>
    %33 = vector.broadcast %3 : vector<1x64xf32> to vector<26x64xf32>
    %34 = arith.addf %32, %33 : vector<26x64xf32>
    %cst_20 = arith.constant 0.000000e+00 : f32
    %35 = vector.broadcast %cst_20 : f32 to vector<26x64xf32>
    %36 = arith.maximumf %34, %35 : vector<26x64xf32>
    %37 = vector.extract_strided_slice %36 {offsets = [0, 0], sizes = [19, 64], strides = [1, 1]} : vector<26x64xf32> to vector<19x64xf32>
    %38 = vector.extract_strided_slice %36 {offsets = [1, 0], sizes = [19, 64], strides = [1, 1]} : vector<26x64xf32> to vector<19x64xf32>
    %39 = vector.extract_strided_slice %36 {offsets = [2, 0], sizes = [19, 64], strides = [1, 1]} : vector<26x64xf32> to vector<19x64xf32>
    %40 = vector.extract_strided_slice %36 {offsets = [3, 0], sizes = [19, 64], strides = [1, 1]} : vector<26x64xf32> to vector<19x64xf32>
    %41 = vector.extract_strided_slice %36 {offsets = [4, 0], sizes = [19, 64], strides = [1, 1]} : vector<26x64xf32> to vector<19x64xf32>
    %42 = vector.extract_strided_slice %36 {offsets = [5, 0], sizes = [19, 64], strides = [1, 1]} : vector<26x64xf32> to vector<19x64xf32>
    %43 = vector.extract_strided_slice %36 {offsets = [6, 0], sizes = [19, 64], strides = [1, 1]} : vector<26x64xf32> to vector<19x64xf32>
    %44 = vector.extract_strided_slice %36 {offsets = [7, 0], sizes = [19, 64], strides = [1, 1]} : vector<26x64xf32> to vector<19x64xf32>
    %45 = tpu.concatenate %37, %38, %39, %40, %41, %42, %43, %44 in 1 : vector<19x64xf32>, vector<19x64xf32>, vector<19x64xf32>, vector<19x64xf32>, vector<19x64xf32>, vector<19x64xf32>, vector<19x64xf32>, vector<19x64xf32> -> vector<19x512xf32>
    %cst_21 = arith.constant dense<0.000000e+00> : vector<19x128xf32>
    %46 = tpu.matmul %45, %4, %cst_21 {dimension_numbers = #tpu.dot_dimension_numbers<[1], [0], [0], [1], [0, 0, 1, 1], [], []>} : vector<19x512xf32>, vector<512x128xf32>, vector<19x128xf32> -> vector<19x128xf32>
    %47 = vector.broadcast %5 : vector<1x128xf32> to vector<19x128xf32>
    %48 = arith.addf %46, %47 : vector<19x128xf32>
    %cst_22 = arith.constant 0.000000e+00 : f32
    %49 = vector.broadcast %cst_22 : f32 to vector<19x128xf32>
    %50 = arith.maximumf %48, %49 : vector<19x128xf32>
    %cst_23 = arith.constant dense<0xFF800000> : vector<128xf32>
    %51 = vector.multi_reduction <maximumf>, %50, %cst_23 [0] : vector<19x128xf32> to vector<128xf32>
    %52 = vector.shape_cast %51 : vector<128xf32> to vector<1x128xf32>
    %53 = vector.broadcast %6 : vector<150x1xf32> to vector<150x128xf32>
    %54 = vector.broadcast %52 : vector<1x128xf32> to vector<150x128xf32>
    %55 = arith.mulf %53, %54 : vector<150x128xf32>
    %56 = vector.broadcast %7 : vector<150x1xf32> to vector<150x128xf32>
    %57 = arith.addf %55, %56 : vector<150x128xf32>
    %cst_24 = arith.constant 0.000000e+00 : f32
    %58 = vector.broadcast %cst_24 : f32 to vector<150x128xf32>
    %59 = arith.maximumf %57, %58 : vector<150x128xf32>
    %c0_25 = arith.constant 0 : index
    %c0_26 = arith.constant 0 : index
    %c0_27 = arith.constant 0 : index
    %60 = vector.load %arg10[%c0_25, %c0_26, %c0_27] : memref<2x150x128xf32, #tpu.memory_space<vmem>>, vector<1x150x128xf32>
    %61 = vector.shape_cast %60 : vector<1x150x128xf32> to vector<150x128xf32>
    %62 = vector.shape_cast %59 : vector<150x128xf32> to vector<1x150x128xf32>
    tpu.vector_store %arg10[%c0_25, %c0_26, %c0_27], %62 {strides = array<i32>} : memref<2x150x128xf32, #tpu.memory_space<vmem>>, vector<1x150x128xf32>,
    %c1 = arith.constant 1 : index
    %c0_28 = arith.constant 0 : index
    %c0_29 = arith.constant 0 : index
    %63 = vector.load %arg1[%c1, %c0_28, %c0_29] : memref<2x41x128xf32, #tpu.memory_space<vmem>>, vector<1x41x128xf32>
    %64 = vector.shape_cast %63 : vector<1x41x128xf32> to vector<41x128xf32>
    %cst_30 = arith.constant dense<0.000000e+00> : vector<41x32xf32>
    %65 = tpu.matmul %64, %0, %cst_30 {dimension_numbers = #tpu.dot_dimension_numbers<[1], [0], [0], [1], [0, 0, 1, 1], [], []>} : vector<41x128xf32>, vector<128x32xf32>, vector<41x32xf32> -> vector<41x32xf32>
    %66 = vector.broadcast %1 : vector<1x32xf32> to vector<41x32xf32>
    %67 = arith.addf %65, %66 : vector<41x32xf32>
    %cst_31 = arith.constant 0.000000e+00 : f32
    %68 = vector.broadcast %cst_31 : f32 to vector<41x32xf32>
    %69 = arith.maximumf %67, %68 : vector<41x32xf32>
    %70 = vector.extract_strided_slice %69 {offsets = [0, 0], sizes = [26, 32], strides = [1, 1]} : vector<41x32xf32> to vector<26x32xf32>
    %71 = vector.extract_strided_slice %69 {offsets = [1, 0], sizes = [26, 32], strides = [1, 1]} : vector<41x32xf32> to vector<26x32xf32>
    %72 = vector.extract_strided_slice %69 {offsets = [2, 0], sizes = [26, 32], strides = [1, 1]} : vector<41x32xf32> to vector<26x32xf32>
    %73 = vector.extract_strided_slice %69 {offsets = [3, 0], sizes = [26, 32], strides = [1, 1]} : vector<41x32xf32> to vector<26x32xf32>
    %74 = vector.extract_strided_slice %69 {offsets = [4, 0], sizes = [26, 32], strides = [1, 1]} : vector<41x32xf32> to vector<26x32xf32>
    %75 = vector.extract_strided_slice %69 {offsets = [5, 0], sizes = [26, 32], strides = [1, 1]} : vector<41x32xf32> to vector<26x32xf32>
    %76 = vector.extract_strided_slice %69 {offsets = [6, 0], sizes = [26, 32], strides = [1, 1]} : vector<41x32xf32> to vector<26x32xf32>
    %77 = vector.extract_strided_slice %69 {offsets = [7, 0], sizes = [26, 32], strides = [1, 1]} : vector<41x32xf32> to vector<26x32xf32>
    %78 = vector.extract_strided_slice %69 {offsets = [8, 0], sizes = [26, 32], strides = [1, 1]} : vector<41x32xf32> to vector<26x32xf32>
    %79 = vector.extract_strided_slice %69 {offsets = [9, 0], sizes = [26, 32], strides = [1, 1]} : vector<41x32xf32> to vector<26x32xf32>
    %80 = vector.extract_strided_slice %69 {offsets = [10, 0], sizes = [26, 32], strides = [1, 1]} : vector<41x32xf32> to vector<26x32xf32>
    %81 = vector.extract_strided_slice %69 {offsets = [11, 0], sizes = [26, 32], strides = [1, 1]} : vector<41x32xf32> to vector<26x32xf32>
    %82 = vector.extract_strided_slice %69 {offsets = [12, 0], sizes = [26, 32], strides = [1, 1]} : vector<41x32xf32> to vector<26x32xf32>
    %83 = vector.extract_strided_slice %69 {offsets = [13, 0], sizes = [26, 32], strides = [1, 1]} : vector<41x32xf32> to vector<26x32xf32>
    %84 = vector.extract_strided_slice %69 {offsets = [14, 0], sizes = [26, 32], strides = [1, 1]} : vector<41x32xf32> to vector<26x32xf32>
    %85 = vector.extract_strided_slice %69 {offsets = [15, 0], sizes = [26, 32], strides = [1, 1]} : vector<41x32xf32> to vector<26x32xf32>
    %86 = tpu.concatenate %70, %71, %72, %73, %74, %75, %76, %77, %78, %79, %80, %81, %82, %83, %84, %85 in 1 : vector<26x32xf32>, vector<26x32xf32>, vector<26x32xf32>, vector<26x32xf32>, vector<26x32xf32>, vector<26x32xf32>, vector<26x32xf32>, vector<26x32xf32>, vector<26x32xf32>, vector<26x32xf32>, vector<26x32xf32>, vector<26x32xf32>, vector<26x32xf32>, vector<26x32xf32>, vector<26x32xf32>, vector<26x32xf32> -> vector<26x512xf32>
    %cst_32 = arith.constant dense<0.000000e+00> : vector<26x64xf32>
    %87 = tpu.matmul %86, %2, %cst_32 {dimension_numbers = #tpu.dot_dimension_numbers<[1], [0], [0], [1], [0, 0, 1, 1], [], []>} : vector<26x512xf32>, vector<512x64xf32>, vector<26x64xf32> -> vector<26x64xf32>
    %88 = vector.broadcast %3 : vector<1x64xf32> to vector<26x64xf32>
    %89 = arith.addf %87, %88 : vector<26x64xf32>
    %cst_33 = arith.constant 0.000000e+00 : f32
    %90 = vector.broadcast %cst_33 : f32 to vector<26x64xf32>
    %91 = arith.maximumf %89, %90 : vector<26x64xf32>
    %92 = vector.extract_strided_slice %91 {offsets = [0, 0], sizes = [19, 64], strides = [1, 1]} : vector<26x64xf32> to vector<19x64xf32>
    %93 = vector.extract_strided_slice %91 {offsets = [1, 0], sizes = [19, 64], strides = [1, 1]} : vector<26x64xf32> to vector<19x64xf32>
    %94 = vector.extract_strided_slice %91 {offsets = [2, 0], sizes = [19, 64], strides = [1, 1]} : vector<26x64xf32> to vector<19x64xf32>
    %95 = vector.extract_strided_slice %91 {offsets = [3, 0], sizes = [19, 64], strides = [1, 1]} : vector<26x64xf32> to vector<19x64xf32>
    %96 = vector.extract_strided_slice %91 {offsets = [4, 0], sizes = [19, 64], strides = [1, 1]} : vector<26x64xf32> to vector<19x64xf32>
    %97 = vector.extract_strided_slice %91 {offsets = [5, 0], sizes = [19, 64], strides = [1, 1]} : vector<26x64xf32> to vector<19x64xf32>
    %98 = vector.extract_strided_slice %91 {offsets = [6, 0], sizes = [19, 64], strides = [1, 1]} : vector<26x64xf32> to vector<19x64xf32>
    %99 = vector.extract_strided_slice %91 {offsets = [7, 0], sizes = [19, 64], strides = [1, 1]} : vector<26x64xf32> to vector<19x64xf32>
    %100 = tpu.concatenate %92, %93, %94, %95, %96, %97, %98, %99 in 1 : vector<19x64xf32>, vector<19x64xf32>, vector<19x64xf32>, vector<19x64xf32>, vector<19x64xf32>, vector<19x64xf32>, vector<19x64xf32>, vector<19x64xf32> -> vector<19x512xf32>
    %cst_34 = arith.constant dense<0.000000e+00> : vector<19x128xf32>
    %101 = tpu.matmul %100, %4, %cst_34 {dimension_numbers = #tpu.dot_dimension_numbers<[1], [0], [0], [1], [0, 0, 1, 1], [], []>} : vector<19x512xf32>, vector<512x128xf32>, vector<19x128xf32> -> vector<19x128xf32>
    %102 = vector.broadcast %5 : vector<1x128xf32> to vector<19x128xf32>
    %103 = arith.addf %101, %102 : vector<19x128xf32>
    %cst_35 = arith.constant 0.000000e+00 : f32
    %104 = vector.broadcast %cst_35 : f32 to vector<19x128xf32>
    %105 = arith.maximumf %103, %104 : vector<19x128xf32>
    %cst_36 = arith.constant dense<0xFF800000> : vector<128xf32>
    %106 = vector.multi_reduction <maximumf>, %105, %cst_36 [0] : vector<19x128xf32> to vector<128xf32>
    %107 = vector.shape_cast %106 : vector<128xf32> to vector<1x128xf32>
    %108 = vector.broadcast %6 : vector<150x1xf32> to vector<150x128xf32>
    %109 = vector.broadcast %107 : vector<1x128xf32> to vector<150x128xf32>
    %110 = arith.mulf %108, %109 : vector<150x128xf32>
    %111 = vector.broadcast %7 : vector<150x1xf32> to vector<150x128xf32>
    %112 = arith.addf %110, %111 : vector<150x128xf32>
    %cst_37 = arith.constant 0.000000e+00 : f32
    %113 = vector.broadcast %cst_37 : f32 to vector<150x128xf32>
    %114 = arith.maximumf %112, %113 : vector<150x128xf32>
    %c1_38 = arith.constant 1 : index
    %c0_39 = arith.constant 0 : index
    %c0_40 = arith.constant 0 : index
    %115 = vector.load %arg10[%c1_38, %c0_39, %c0_40] : memref<2x150x128xf32, #tpu.memory_space<vmem>>, vector<1x150x128xf32>
    %116 = vector.shape_cast %115 : vector<1x150x128xf32> to vector<150x128xf32>
    %117 = vector.shape_cast %114 : vector<150x128xf32> to vector<1x150x128xf32>
    tpu.vector_store %arg10[%c1_38, %c0_39, %c0_40], %117 {strides = array<i32>} : memref<2x150x128xf32, #tpu.memory_space<vmem>>, vector<1x150x128xf32>,
    return
  }
  func.func @transform_0(%arg0: i32) -> (i32, i32, i32) {
    %c0_i32 = arith.constant 0 : i32
    %c0_i32_0 = arith.constant 0 : i32
    %c0_i32_1 = arith.constant 0 : i32
    return %arg0, %c0_i32, %c0_i32_0 : i32, i32, i32
  }
  func.func @transform_1(%arg0: i32) -> (i32, i32) {
    %c0_i32 = arith.constant 0 : i32
    %c0_i32_0 = arith.constant 0 : i32
    %c0_i32_1 = arith.constant 0 : i32
    return %c0_i32, %c0_i32_0 : i32, i32
  }
  func.func @transform_2(%arg0: i32) -> (i32, i32) {
    %c0_i32 = arith.constant 0 : i32
    %c0_i32_0 = arith.constant 0 : i32
    %c0_i32_1 = arith.constant 0 : i32
    return %c0_i32, %c0_i32_0 : i32, i32
  }
  func.func @transform_3(%arg0: i32) -> (i32, i32) {
    %c0_i32 = arith.constant 0 : i32
    %c0_i32_0 = arith.constant 0 : i32
    %c0_i32_1 = arith.constant 0 : i32
    return %c0_i32, %c0_i32_0 : i32, i32
  }
  func.func @transform_4(%arg0: i32) -> (i32, i32) {
    %c0_i32 = arith.constant 0 : i32
    %c0_i32_0 = arith.constant 0 : i32
    %c0_i32_1 = arith.constant 0 : i32
    return %c0_i32, %c0_i32_0 : i32, i32
  }
  func.func @transform_5(%arg0: i32) -> (i32, i32) {
    %c0_i32 = arith.constant 0 : i32
    %c0_i32_0 = arith.constant 0 : i32
    %c0_i32_1 = arith.constant 0 : i32
    return %c0_i32, %c0_i32_0 : i32, i32
  }
  func.func @transform_6(%arg0: i32) -> (i32, i32) {
    %c0_i32 = arith.constant 0 : i32
    %c0_i32_0 = arith.constant 0 : i32
    %c0_i32_1 = arith.constant 0 : i32
    return %c0_i32, %c0_i32_0 : i32, i32
  }
  func.func @transform_7(%arg0: i32) -> (i32, i32) {
    %c0_i32 = arith.constant 0 : i32
    %c0_i32_0 = arith.constant 0 : i32
    %c0_i32_1 = arith.constant 0 : i32
    return %c0_i32, %c0_i32_0 : i32, i32
  }
  func.func @transform_8(%arg0: i32) -> (i32, i32) {
    %c0_i32 = arith.constant 0 : i32
    %c0_i32_0 = arith.constant 0 : i32
    %c0_i32_1 = arith.constant 0 : i32
    return %c0_i32, %c0_i32_0 : i32, i32
  }
  func.func @transform_9(%arg0: i32) -> (i32, i32, i32) {
    %c0_i32 = arith.constant 0 : i32
    %c0_i32_0 = arith.constant 0 : i32
    %c0_i32_1 = arith.constant 0 : i32
    return %arg0, %c0_i32, %c0_i32_0 : i32, i32, i32
  }
}

</mosaic_0001>

<bundles_post_ra>
// kernel: tpu_custom_call.1
= control target key start
LH: loop header
LB: loop body
LE: loop exit
PB: predicated region body
PF: predicated region fallthrough
CT: control target
= control target key end

     0   :  { %vm374_vm0 = vcmask 1044480   ;;  %vm447_vm1 = vcmask 1040384   ;;  %vm334_vm2 = vcmask 1046528   ;;  %vm406_vm3 = vcmask 1042432   ;;  %s3010_s13 = smov 96   ;;  %s3011_s16 = smov 32   ;;  %s4881_s1 = inlined_call_operand.vmem [shape: f32[128,32], index: 1, kind: input, shape index: {}]   ;;  %s4882_s0 = inlined_call_operand.vmem [shape: f32[2,41,128], index: 0, kind: input, shape index: {}]   ;;  %s4883_s3 = inlined_call_operand.vmem [shape: f32[512,64], index: 3, kind: input, shape index: {}]   ;;  %s4884_s2 = inlined_call_operand.vmem [shape: f32[1,32], index: 2, kind: input, shape index: {}]   ;;  %s4885_s5 = inlined_call_operand.vmem [shape: f32[512,128], index: 5, kind: input, shape index: {}]   ;;  %s4886_s4 = inlined_call_operand.vmem [shape: f32[1,64], index: 4, kind: input, shape index: {}]   ;;  %s4887_s6 = inlined_call_operand.vmem [shape: f32[1,128], index: 6, kind: input, shape index: {}]   ;;  %s4888_s7 = inlined_call_operand.vmem [shape: f32[150,1], index: 7, kind: input, shape index: {}]   ;;  %s4889_s8 = inlined_call_operand.vmem [shape: f32[150,1], index: 8, kind: input, shape index: {}]   ;;  %s4890_s9 = inlined_call_operand.vmem [shape: f32[2,150,128], index: 9, kind: output, shape index: {}]  }
   0x1   :  { %v47_v0 = vld [vmem:[%s4881_s1 + $0x78] sm:$0xff]  ;;  %v46_v1 = vld [vmem:[%s4881_s1 + $0x70] sm:$0xff]  ;;  %v45_v2 = vld [vmem:[%s4881_s1 + $0x68] sm:$0xff]  ;;  %vm354_vm4 = vcmask 1045504   ;;  %vm426_vm5 = vcmask 1041408   ;;  %s3012_s17 = smov 64  }
   0x2   :  { %2547 = vmatprep.subr.mxu0 %v47_v0  ;;  %v44_v3 = vld [vmem:[%s4881_s1 + $0x60] sm:$0xff]  ;;  %v43_v5 = vld [vmem:[%s4881_s1 + $0x58] sm:$0xff]  ;;  %v42_v6 = vld [vmem:[%s4881_s1 + $0x50] sm:$0xff]  ;;  %vm394_vm6 = vcmask 1043456   ;;  %vm519_vm7 = vcmask 261120   ;;  %vm524_vm8 = vcmask 523264  }
   0x3   :  { %2548 = vmatpush3.msra.mxu0 %v47_v0  ;;  %v217_v4 = vld [vmem:[%s4882_s0] sm:$0xff]  ;;  %v41_v7 = vld [vmem:[%s4881_s1 + $0x48] sm:$0xff]  ;;  %v39_v9 = vld [vmem:[%s4881_s1 + $0x38] sm:$0xff]  ;;  %vm529_vm9 = vcmask 785408  }
   0x4   :  { %2549 = vmatprep.subr.mxu0 %v46_v1  ;;  %2579 = vmatprep.mubr.f32.mxu0 %v217_v4  ;;  %v40_v8 = vld [vmem:[%s4881_s1 + $0x40] sm:$0xff]  ;;  %v38_v10 = vld [vmem:[%s4881_s1 + $0x30] sm:$0xff]  ;;  %v37_v11 = vld [vmem:[%s4881_s1 + $0x28] sm:$0xff] }
   0x5   :  { %2550 = vmatpush3.msra.mxu0 %v46_v1  ;;  %v36_v12 = vld [vmem:[%s4881_s1 + $0x20] sm:$0xff]  ;;  %v35_v13 = vld [vmem:[%s4881_s1 + $0x18] sm:$0xff]  ;;  %v34_v14 = vld [vmem:[%s4881_s1 + $0x10] sm:$0xff] }
   0x6   :  { %2551 = vmatprep.subr.mxu0 %v45_v2  ;;  %v33_v15 = vld [vmem:[%s4881_s1 + $0x8] sm:$0xff]  ;;  %v32_v16 = vld [vmem:[%s4881_s1] sm:$0xff]  ;;  %v219_v18 = vld [vmem:[%s4882_s0 + $0x10] sm:$0xff] }
   0x7   :  { %2552 = vmatpush3.msra.mxu0 %v45_v2  ;;  %v218_v17 = vld [vmem:[%s4882_s0 + $0x8] sm:$0xff]  ;;  %v220_v19 = vld [vmem:[%s4882_s0 + $0x18] sm:$0xff]  ;;  %v221_v20 = vld [vmem:[%s4882_s0 + $0x20] sm:$0xff] }
   0x8   :  { %2553 = vmatprep.subr.mxu0 %v44_v3  ;;  %v222_v21 = vld [vmem:[%s4882_s0 + $0x28] sm:$0x1]  ;;  %v80_v22 = vld [vmem:[%s4883_s3 + $0xf8] sm:$0xff]  ;;  %v79_v24 = vld [vmem:[%s4883_s3 + $0xf0] sm:$0xff] }
   0x9   :  { %2554 = vmatpush3.msra.mxu0 %v44_v3  ;;  %v64_v23 = vld [vmem:[%s4883_s3 + $0x78] sm:$0xff]  ;;  %2185 = vmatprep.subr.mxu1 %v80_v22  ;;  %v63_v25 = vld [vmem:[%s4883_s3 + $0x70] sm:$0xff]  ;;  %v78_v27 = vld [vmem:[%s4883_s3 + $0xe8] sm:$0xff] }
   0xa   :  { %2555 = vmatprep.subr.mxu0 %v43_v5  ;;  %v112_v26 = vld [vmem:[%s4883_s3 + $0x1f8] sm:$0xff]  ;;  %2186 = vmatpush3.msra.mxu1 %v64_v23  ;;  %v62_v29 = vld [vmem:[%s4883_s3 + $0x68] sm:$0xff]  ;;  %v111_v30 = vld [vmem:[%s4883_s3 + $0x1f0] sm:$0xff] }
   0xb   :  { %2556 = vmatpush3.msra.mxu0 %v43_v5  ;;  %v96_v28 = vld [vmem:[%s4883_s3 + $0x178] sm:$0xff]  ;;  %2187 = vmatprep.subr.mxu1 %v79_v24  ;;  %v95_v31 = vld [vmem:[%s4883_s3 + $0x170] sm:$0xff]  ;;  %v77_v32 = vld [vmem:[%s4883_s3 + $0xe0] sm:$0xff] }
   0xc   :  { %2557 = vmatprep.subr.mxu0 %v42_v6  ;;  %2188 = vmatpush3.msra.mxu1 %v63_v25  ;;  %v110_v33 = vld [vmem:[%s4883_s3 + $0x1e8] sm:$0xff]  ;;  %v61_v34 = vld [vmem:[%s4883_s3 + $0x60] sm:$0xff]  ;;  %v76_v37 = vld [vmem:[%s4883_s3 + $0xd8] sm:$0xff] }
   0xd   :  { %2558 = vmatpush3.msra.mxu0 %v42_v6  ;;  %2189 = vmatprep.subr.mxu1 %v78_v27  ;;  %v94_v35 = vld [vmem:[%s4883_s3 + $0x168] sm:$0xff]  ;;  %v109_v36 = vld [vmem:[%s4883_s3 + $0x1e0] sm:$0xff]  ;;  %v60_v39 = vld [vmem:[%s4883_s3 + $0x58] sm:$0xff] }
   0xe   :  { %2559 = vmatprep.subr.mxu0 %v41_v7  ;;  %2190 = vmatpush3.msra.mxu1 %v62_v29  ;;  %v93_v38 = vld [vmem:[%s4883_s3 + $0x160] sm:$0xff]  ;;  %v108_v40 = vld [vmem:[%s4883_s3 + $0x1d8] sm:$0xff]  ;;  %v75_v41 = vld [vmem:[%s4883_s3 + $0xd0] sm:$0xff] }
   0xf   :  { %2560 = vmatpush3.msra.mxu0 %v41_v7  ;;  %2191 = vmatprep.subr.mxu1 %v77_v32  ;;  %v92_v42 = vld [vmem:[%s4883_s3 + $0x158] sm:$0xff]  ;;  %v59_v43 = vld [vmem:[%s4883_s3 + $0x50] sm:$0xff]  ;;  %v74_v45 = vld [vmem:[%s4883_s3 + $0xc8] sm:$0xff] }
  0x10   :  { %2561 = vmatprep.subr.mxu0 %v40_v8  ;;  %2192 = vmatpush3.msra.mxu1 %v61_v34  ;;  %v107_v44 = vld [vmem:[%s4883_s3 + $0x1d0] sm:$0xff]  ;;  %v58_v47 = vld [vmem:[%s4883_s3 + $0x48] sm:$0xff]  ;;  %v73_v49 = vld [vmem:[%s4883_s3 + $0xc0] sm:$0xff] }
  0x11   :  { %2562 = vmatpush3.msra.mxu0 %v40_v8  ;;  %2193 = vmatprep.subr.mxu1 %v76_v37  ;;  %v91_v46 = vld [vmem:[%s4883_s3 + $0x150] sm:$0xff]  ;;  %v106_v48 = vld [vmem:[%s4883_s3 + $0x1c8] sm:$0xff]  ;;  %v57_v51 = vld [vmem:[%s4883_s3 + $0x40] sm:$0xff] }
  0x12   :  { %2563 = vmatprep.subr.mxu0 %v39_v9  ;;  %2194 = vmatpush3.msra.mxu1 %v60_v39  ;;  %v90_v50 = vld [vmem:[%s4883_s3 + $0x148] sm:$0xff]  ;;  %v105_v52 = vld [vmem:[%s4883_s3 + $0x1c0] sm:$0xff]  ;;  %v72_v53 = vld [vmem:[%s4883_s3 + $0xb8] sm:$0xff] }
  0x13   :  { %2564 = vmatpush3.msra.mxu0 %v39_v9  ;;  %2195 = vmatprep.subr.mxu1 %v75_v41  ;;  %v89_v54 = vld [vmem:[%s4883_s3 + $0x140] sm:$0xff]  ;;  %v56_v55 = vld [vmem:[%s4883_s3 + $0x38] sm:$0xff]  ;;  %v71_v57 = vld [vmem:[%s4883_s3 + $0xb0] sm:$0xff] }
  0x14   :  { %2565 = vmatprep.subr.mxu0 %v38_v10  ;;  %2196 = vmatpush3.msra.mxu1 %v59_v43  ;;  %v104_v56 = vld [vmem:[%s4883_s3 + $0x1b8] sm:$0xff]  ;;  %v55_v59 = vld [vmem:[%s4883_s3 + $0x30] sm:$0xff]  ;;  %v70_v61 = vld [vmem:[%s4883_s3 + $0xa8] sm:$0xff] }
  0x15   :  { %2566 = vmatpush3.msra.mxu0 %v38_v10  ;;  %2197 = vmatprep.subr.mxu1 %v74_v45  ;;  %v88_v58 = vld [vmem:[%s4883_s3 + $0x138] sm:$0xff]  ;;  %v103_v60 = vld [vmem:[%s4883_s3 + $0x1b0] sm:$0xff]  ;;  %v54_v62 = vld [vmem:[%s4883_s3 + $0x28] sm:$0xff] }
  0x16   :  { %2567 = vmatprep.subr.mxu0 %v37_v11  ;;  %2198 = vmatpush3.msra.mxu1 %v58_v47  ;;  %v69_v63 = vld [vmem:[%s4883_s3 + $0xa0] sm:$0xff]  ;;  %v87_v3 = vld [vmem:[%s4883_s3 + $0x130] sm:$0xff]  ;;  %v68_v4 = vld [vmem:[%s4883_s3 + $0x98] sm:$0xff] }
  0x17   :  { %2568 = vmatpush3.msra.mxu0 %v37_v11  ;;  %2199 = vmatprep.subr.mxu1 %v73_v49  ;;  %v3259_v0 = vld [vmem:[%s4884_s2] ss:$0 sm:$0xff]  ;;  %v102_v6 = vld [vmem:[%s4883_s3 + $0x1a8] sm:$0xff]  ;;  %v52_v7 = vld [vmem:[%s4883_s3 + $0x18] sm:$0xff] }
  0x18   :  { %2569 = vmatprep.subr.mxu0 %v36_v12  ;;  %2200 = vmatpush3.msra.mxu1 %v57_v51  ;;  %v53_v2 = vld [vmem:[%s4883_s3 + $0x20] sm:$0xff]  ;;  %v86_v8 = vld [vmem:[%s4883_s3 + $0x128] sm:$0xff]  ;;  %v67_v10 = vld [vmem:[%s4883_s3 + $0x90] sm:$0xff] }
  0x19   :  { %2570 = vmatpush3.msra.mxu0 %v36_v12  ;;  %2201 = vmatprep.subr.mxu1 %v72_v53  ;;  %v101_v11 = vld [vmem:[%s4883_s3 + $0x1a0] sm:$0xff]  ;;  %v84_v22 = vld [vmem:[%s4883_s3 + $0x118] sm:$0xff]  ;;  %v99_v29 = vld [vmem:[%s4883_s3 + $0x190] sm:$0xff] }
  0x1a   :  { %2571 = vmatprep.subr.mxu0 %v35_v13  ;;  %2202 = vmatpush3.msra.mxu1 %v56_v55  ;;  %v49_v39 = vld [vmem:[%s4883_s3] sm:$0xff]  ;;  %v98_v45 = vld [vmem:[%s4883_s3 + $0x188] sm:$0xff] }
  0x1b   :  { %2572 = vmatpush3.msra.mxu0 %v35_v13  ;;  %2203 = vmatprep.subr.mxu1 %v71_v57  ;;  %v97_v47 = vld [vmem:[%s4883_s3 + $0x180] sm:$0xff] }
  0x1c   :  { %2573 = vmatprep.subr.mxu0 %v34_v14  ;;  %2204 = vmatpush3.msra.mxu1 %v55_v59 }
  0x1d   :  { %2574 = vmatpush3.msra.mxu0 %v34_v14  ;;  %2205 = vmatprep.subr.mxu1 %v70_v61  ;;  %v81_v61 = vld [vmem:[%s4883_s3 + $0x100] sm:$0xff] }
  0x1e   :  { %2575 = vmatprep.subr.mxu0 %v33_v15  ;;  %2206 = vmatpush3.msra.mxu1 %v54_v62 }
  0x1f   :  { %2576 = vmatpush3.msra.mxu0 %v33_v15  ;;  %2207 = vmatprep.subr.mxu1 %v69_v63  ;;  %v51_v15 = vld [vmem:[%s4883_s3 + $0x10] sm:$0xff] }
  0x20   :  { %2577 = vmatprep.subr.mxu0 %v32_v16  ;;  %2208 = vmatpush3.msra.mxu1 %v53_v2 }
  0x21   :  { %2578 = vmatpush3.msra.mxu0 %v32_v16  ;;  %2209 = vmatprep.subr.mxu1 %v68_v4  ;;  %v85_v16 = vld [vmem:[%s4883_s3 + $0x120] sm:$0xff] }
  0x22   :  { %2580 = vmatmul.mubr.f32.vlgmr.msra.gmra.mxu0 %v218_v17  ;;  %2229 = vmatprep.subr.mxu0 %v112_v26  ;;  %v66_v17 = vld [vmem:[%s4883_s3 + $0x88] sm:$0xff] }
  0x23   :  { %2582 = vmatprep.mubr.f32.mxu0 %v219_v18  ;;  %2230 = vmatpush3.msra.mxu0 %v96_v28  ;;  %v65_v28 = vld [vmem:[%s4883_s3 + $0x80] sm:$0xff] }
  0x24   :  { %2231 = vmatprep.subr.mxu0 %v111_v30  ;;  %2210 = vmatpush3.msra.mxu1 %v52_v7 }
  0x25   :  { %2232 = vmatpush3.msra.mxu0 %v95_v31  ;;  %2211 = vmatprep.subr.mxu1 %v67_v10 }
  0x26   :  { %2583 = vmatmul.mubr.f32.gmra.mxu0 %v220_v19  ;;  %2233 = vmatprep.subr.mxu0 %v110_v33 }
  0x27   :  { %2585 = vmatprep.mubr.f32.mxu0 %v221_v20  ;;  %2234 = vmatpush3.msra.mxu0 %v94_v35  ;;  %v100_v20 = vld [vmem:[%s4883_s3 + $0x198] sm:$0xff] }
  0x28   :  { %2235 = vmatprep.subr.mxu0 %v109_v36  ;;  %2212 = vmatpush3.msra.mxu1 %v51_v15 }
  0x29   :  { %2236 = vmatpush3.msra.mxu0 %v93_v38  ;;  %2213 = vmatprep.subr.mxu1 %v66_v17 }
  0x2a   :  { %2586 = vmatmul.mubr.f32.gmra.mxu0 %v222_v21  ;;  %2237 = vmatprep.subr.mxu0 %v108_v40  ;;  %v50_v21 = vld [vmem:[%s4883_s3 + $0x8] sm:$0xff]  ;;  %v83_v40 = vld [vmem:[%s4883_s3 + $0x110] sm:$0xff] }
  0x2b   :  { %2238 = vmatpush3.msra.mxu0 %v92_v42  ;;  %2214 = vmatpush3.msra.mxu1 %v50_v21 }
  0x2c   :  { %2239 = vmatprep.subr.mxu0 %v107_v44  ;;  %2215 = vmatprep.subr.mxu1 %v65_v28 }
  0x2d   :  { %2240 = vmatpush3.msra.mxu0 %v91_v46  ;;  %2216 = vmatpush3.msra.mxu1 %v49_v39  ;;  %v82_v46 = vld [vmem:[%s4883_s3 + $0x108] sm:$0xff] }
  0x2e   :  { %2241 = vmatprep.subr.mxu0 %v106_v48 }
  0x2f   :  { %2242 = vmatpush3.msra.mxu0 %v90_v50 }
  0x30   :  { %2243 = vmatprep.subr.mxu0 %v105_v52 }
  0x31   :  { %2244 = vmatpush3.msra.mxu0 %v89_v54 }
  0x32   :  { %2245 = vmatprep.subr.mxu0 %v104_v56 }
  0x33   :  { %2246 = vmatpush3.msra.mxu0 %v88_v58 }
  0x34   :  { %2247 = vmatprep.subr.mxu0 %v103_v60 }
  0x35   :  { %2248 = vmatpush3.msra.mxu0 %v87_v3 }
  0x36   :  { %2249 = vmatprep.subr.mxu0 %v102_v6 }
  0x37   :  { %2250 = vmatpush3.msra.mxu0 %v86_v8 }
  0x38   :  { %2251 = vmatprep.subr.mxu0 %v101_v11 }
  0x39   :  { %2252 = vmatpush3.msra.mxu0 %v85_v16 }
  0x3a   :  { %2253 = vmatprep.subr.mxu0 %v100_v20 }
  0x3b   :  { %2254 = vmatpush3.msra.mxu0 %v84_v22 }
  0x3c   :  { %2255 = vmatprep.subr.mxu0 %v99_v29 }
  0x3d   :  { %2256 = vmatpush3.msra.mxu0 %v83_v40 }
  0x3e   :  { %2257 = vmatprep.subr.mxu0 %v98_v45 }
  0x3f   :  { %2258 = vmatpush3.msra.mxu0 %v82_v46 }
  0x40   :  { %2259 = vmatprep.subr.mxu0 %v97_v47 }
  0x41   :  { %2260 = vmatpush3.msra.mxu0 %v81_v61 }
  0xe2   :  { %v2581_v1 = vpop.f32.mrf.mxu0 }
  0xe3   :  { %v301_v5 = vadd.f32 %v2581_v1, %v3259_v0 }
  0xe4   :  { %v295_v9 = vpop.f32.mrf.mxu0 }
  0xe5   :  { %v3286_v12 = vmax.f32 %v301_v5, 0.0  ;;  %v296_v13 = vadd.f32 %v3259_v0, %v295_v9 }
  0xe6   :  { %v2584_v14 = vpop.f32.mrf.mxu0 }
  0xe7   :  { %v3298_v18 = vmax.f32 %v296_v13, 0.0  ;;  %v311_v19 = vadd.f32 %v2584_v14, %v3259_v0  ;;  %v376_v24 = vrot.slane %v3286_v12, 3  ;;  %v449_v25 = vrot.slane %v3286_v12, 7 }
  0xe8   :  { %v305_v23 = vpop.f32.mrf.mxu0  ;;  %v336_v26 = vrot.slane %v3286_v12, 1  ;;  %v408_v27 = vrot.slane %v3286_v12, 5  ;;  %v356_v33 = vrot.slane %v3286_v12, 2  ;;  %v428_v44 = vrot.slane %v3286_v12, 6 }
  0xe9   :  { %v306_v30 = vadd.f32 %v3259_v0, %v305_v23  ;;  %v375_v31 = vrot.slane %v3298_v18, 3  ;;  %v448_v32 = vrot.slane %v3298_v18, 7  ;;  %v335_v35 = vrot.slane %v3298_v18, 1 }
  0xea   :  { %v2587_v34 = vpop.f32.mrf.mxu0  ;;  %v407_v36 = vrot.slane %v3298_v18, 5  ;;  %v355_v37 = vrot.slane %v3298_v18, 2  ;;  %v427_v38 = vrot.slane %v3298_v18, 6  ;;  %v3348_v48 = vmax.f32 %v311_v19, 0.0 }
  0xeb   :  { %v3334_v41 = vmax.f32 %v306_v30, 0.0  ;;  %v377_v42 = vsel %vm374_vm0, %v375_v31, %v376_v24  ;;  %v450_v43 = vsel %vm447_vm1, %v448_v32, %v449_v25  ;;  %v337_v51 = vsel %vm334_vm2, %v335_v35, %v336_v26 }
  0xec   :  { %v315_v49 = vpop.f32.mrf.mxu0  ;;  %v2643_v50 = vpack.i.bf16 %v377_v42, %v450_v43  ;;  %v409_v52 = vsel %vm406_vm3, %v407_v36, %v408_v27  ;;  %v357_v56 = vsel %vm354_vm4, %v355_v37, %v356_v33  ;;  %v429_v58 = vsel %vm426_vm5, %v427_v38, %v428_v44 }
  0xed   :  { %v316_v53 = vadd.f32 %v3259_v0, %v315_v49  ;;  %v2633_v54 = vpack.i.bf16 %v337_v51, %v409_v52  ;;  %v338_v55 = vrot.slane %v3334_v41, 1  ;;  %v410_v57 = vrot.slane %v3334_v41, 5 }
  0xee   :  { %2644 = vrot.lane.b32.xlu1 %v2643_v50, %s3010_s13  ;;  %v378_v59 = vrot.slane %v3334_v41, 3  ;;  %v451_v60 = vrot.slane %v3334_v41, 7  ;;  %v321_v62 = vadd.f32 %v2587_v34, %v3259_v0  ;;  %v2638_v3 = vpack.i.bf16 %v357_v56, %v429_v58 }
  0xef   :  { %v3364_v63 = vmax.f32 %v316_v53, 0.0  ;;  %2634 = vrot.lane.b32.xlu0 %v2633_v54, %s3011_s16  ;;  %v339_v1 = vsel %vm334_vm2, %v336_v26, %v338_v55  ;;  %v411_v2 = vsel %vm406_vm3, %v408_v27, %v410_v57  ;;  %v358_v5 = vrot.slane %v3334_v41, 2 }
  0xf0   :  { %v379_v4 = vsel %vm374_vm0, %v376_v24, %v378_v59  ;;  %v2648_v6 = vpack.i.bf16 %v339_v1, %v411_v2  ;;  %v452_v7 = vsel %vm447_vm1, %v449_v25, %v451_v60  ;;  %v430_v0 = vrot.slane %v3334_v41, 6 }
  0xf1   :  { %v360_v8 = vrot.slane %v3348_v48, 2  ;;  %v359_v9 = vsel %vm354_vm4, %v356_v33, %v358_v5  ;;  %v432_v10 = vrot.slane %v3348_v48, 6  ;;  %v340_v11 = vrot.slane %v3348_v48, 1 }
  0xf2   :  { %v412_v13 = vrot.slane %v3348_v48, 5  ;;  %v329_v14 = vmax.f32 %v321_v62, 0.0  ;;  %2649 = vrot.lane.b32.xlu1 %v2648_v6, %s3011_s16  ;;  %v431_v15 = vsel %vm426_vm5, %v428_v44, %v430_v0  ;;  %v2658_v16 = vpack.i.bf16 %v379_v4, %v452_v7 }
  0xf3   :  { %2639 = vrot.lane.b32.xlu0 %v2638_v3, %s3012_s17  ;;  %v361_v17 = vsel %vm354_vm4, %v358_v5, %v360_v8  ;;  %v469_v19 = vrot.slane %v3364_v63, 1  ;;  %v497_v20 = vrot.slane %v3364_v63, 5  ;;  %v2653_v21 = vpack.i.bf16 %v359_v9, %v431_v15 }
  0xf4   :  { %v433_v22 = vsel %vm426_vm5, %v430_v0, %v432_v10  ;;  %v341_v23 = vsel %vm334_vm2, %v338_v55, %v340_v11  ;;  %v413_v24 = vsel %vm406_vm3, %v410_v57, %v412_v13  ;;  %v380_v25 = vrot.slane %v3348_v48, 3 }
  0xf5   :  { %v453_v26 = vrot.slane %v3348_v48, 7  ;;  %v514_v27 = vrot.slane %v329_v14, 7  ;;  %v2668_v28 = vpack.i.bf16 %v361_v17, %v433_v22  ;;  %v2663_v29 = vpack.i.bf16 %v341_v23, %v413_v24 }
  0xf6   :  { %2659 = vrot.lane.b32.xlu1 %v2658_v16, %s3010_s13  ;;  %v470_v30 = vsel %vm334_vm2, %v340_v11, %v469_v19  ;;  %v498_v31 = vsel %vm406_vm3, %v412_v13, %v497_v20  ;;  %v455_v32 = vrot.slane %v3364_v63, 7  ;;  %v485_v33 = vrot.slane %v3364_v63, 3 }
  0xf7   :  { %2654 = vrot.lane.b32.xlu0 %v2653_v21, %s3012_s17  ;;  %v381_v34 = vsel %vm374_vm0, %v378_v59, %v380_v25  ;;  %v454_v35 = vsel %vm447_vm1, %v451_v60, %v453_v26  ;;  %v477_v36 = vrot.slane %v3364_v63, 2  ;;  %v505_v37 = vrot.slane %v3364_v63, 6 }
  0xf8   :  { %v3401_v38 = vpack.i.bf16 %v469_v19, %v497_v20  ;;  %v2678_v39 = vpack.i.bf16 %v470_v30, %v498_v31  ;;  %v2673_v40 = vpack.i.bf16 %v381_v34, %v454_v35  ;;  %v456_v42 = vsel %vm447_vm1, %v453_v26, %v455_v32 }
  0xf9   :  { %v515_v43 = vsel %vm447_vm1, %v455_v32, %v514_v27  ;;  %v486_v44 = vsel %vm374_vm0, %v380_v25, %v485_v33  ;;  %v478_v45 = vsel %vm354_vm4, %v360_v8, %v477_v36  ;;  %v506_v46 = vsel %vm426_vm5, %v432_v10, %v505_v37 }
  0xfa   :  { %2669 = vrot.lane.b32.xlu1 %v2668_v28, %s3012_s17  ;;  %v3412_v47 = vpack.i.bf16 %v485_v33, %v515_v43  ;;  %v2688_v49 = vpack.i.bf16 %v486_v44, %v456_v42  ;;  %v2683_v50 = vpack.i.bf16 %v478_v45, %v506_v46  ;;  %v2698_v51 = vpack.i.bf16 %v360_v8, %v432_v10 }
  0xfb   :  { %2664 = vrot.lane.b32.xlu0 %v2663_v29, %s3011_s16  ;;  %v2693_v52 = vpack.i.bf16 %v340_v11, %v412_v13  ;;  %v395_v55 = vrot.slane %v3298_v18, 4  ;;  %v396_v58 = vrot.slane %v3286_v12, 4  ;;  %v398_v62 = vrot.slane %v3334_v41, 4 }
  0xfc   :  { %v400_v22 = vrot.slane %v3348_v48, 4 }
  0xfd   :  { %v397_v61 = vsel %vm394_vm6, %v395_v55, %v396_v58  ;;  %v399_v15 = vsel %vm394_vm6, %v396_v58, %v398_v62 }
  0xfe   :  { %2679 = vrot.lane.b32.xlu1 %v2678_v39, %s3011_s16 }
  0xff   :  { %2674 = vrot.lane.b32.xlu0 %v2673_v40, %s3010_s13  ;;  %v493_v40 = vrot.slane %v3364_v63, 4 }
 0x102   :  { %2689 = vrot.lane.b32.xlu1 %v2688_v49, %s3010_s13 }
 0x103   :  { %2684 = vrot.lane.b32.xlu0 %v2683_v50, %s3012_s17 }
 0x106   :  { %2699 = vrot.lane.b32.xlu1 %v2698_v51, %s3012_s17 }
 0x107   :  { %2694 = vrot.lane.b32.xlu0 %v2693_v52, %s3011_s16 }
 0x10b   :  { %388 = vrot.lane.b32.xlu0 %v380_v25, %s3010_s13 }
 0x160   :  { %v2645_v53 = vpop.permute.xlu1 %2644 }
 0x161   :  { %v2635_v54 = vpop.permute.xlu0 %2634  ;;  %v2647_v1 = vunpack.i.h.bf16 %v2645_v53  ;;  %v2646_v2 = vunpack.i.l.bf16 %v2645_v53 }
 0x162   :  { %v2637_v56 = vunpack.i.h.bf16 %v2635_v54  ;;  %v2636_v57 = vunpack.i.l.bf16 %v2635_v54 }
 0x164   :  { %v2650_v59 = vpop.permute.xlu1 %2649  ;;  %v534_v7 = vsel %vm519_vm7, %v397_v61, %v2636_v57  ;;  %v520_v0 = vsel %vm519_vm7, %v3298_v18, %v2637_v56 }
 0x165   :  { %v2640_v60 = vpop.permute.xlu0 %2639  ;;  %v2652_v5 = vunpack.i.h.bf16 %v2650_v59  ;;  %v2651_v6 = vunpack.i.l.bf16 %v2650_v59 }
 0x166   :  { %v2642_v3 = vunpack.i.h.bf16 %v2640_v60  ;;  %v2641_v4 = vunpack.i.l.bf16 %v2640_v60 }
 0x167   :  { %v535_v18 = vsel %vm519_vm7, %v399_v15, %v2651_v6  ;;  %v521_v21 = vsel %vm519_vm7, %v3286_v12, %v2652_v5  ;;  %v401_v12 = vsel %vm394_vm6, %v398_v62, %v400_v22  ;;  %v3470_v15 = vld [vmem:[%s4885_s5 + $0xf8] sm:$0xff] }
 0x168   :  { %v538_v8 = vsel %vm524_vm8, %v534_v7, %v2641_v4  ;;  %v525_v9 = vsel %vm524_vm8, %v520_v0, %v2642_v3  ;;  %v2660_v10 = vpop.permute.xlu1 %2659  ;;  %2273 = vmatprep.subr.mxu1 %v3470_v15 }
 0x169   :  { %v2655_v11 = vpop.permute.xlu0 %2654  ;;  %v542_v13 = vsel %vm529_vm9, %v538_v8, %v2646_v2  ;;  %v530_v14 = vsel %vm529_vm9, %v525_v9, %v2647_v1  ;;  %v2662_v16 = vunpack.i.h.bf16 %v2660_v10  ;;  %v2661_v17 = vunpack.i.l.bf16 %v2660_v10 }
 0x16a   :  { %v2657_v19 = vunpack.i.h.bf16 %v2655_v11  ;;  %v2656_v20 = vunpack.i.l.bf16 %v2655_v11  ;;  %628 = vmatprep.mubr.f32.mxu1 %v542_v13 }
 0x16b   :  { %629 = vmatmul.mubr.f32.vlgmr.msra.gmra.mxu1 %v530_v14 }
 0x16c   :  { %v539_v23 = vsel %vm524_vm8, %v535_v18, %v2656_v20  ;;  %v526_v24 = vsel %vm524_vm8, %v521_v21, %v2657_v19  ;;  %v2670_v25 = vpop.permute.xlu1 %2669  ;;  %v143_v19 = vld [vmem:[%s4885_s5 + $0xe8] sm:$0xff]  ;;  %v142_v18 = vld [vmem:[%s4885_s5 + $0xe0] sm:$0xff] }
 0x16d   :  { %v2665_v26 = vpop.permute.xlu0 %2664  ;;  %v543_v27 = vsel %vm529_vm9, %v539_v23, %v2661_v17  ;;  %v531_v28 = vsel %vm529_vm9, %v526_v24, %v2662_v16  ;;  %v2672_v31 = vunpack.i.h.bf16 %v2670_v25  ;;  %v2671_v32 = vunpack.i.l.bf16 %v2670_v25  ;;  %v144_v16 = vld [vmem:[%s4885_s5 + $0xf0] sm:$0xff]  ;;  %v127_v20 = vld [vmem:[%s4885_s5 + $0x68] sm:$0xff]  ;;  %v126_v21 = vld [vmem:[%s4885_s5 + $0x60] sm:$0xff] }
 0x16e   :  { %v2667_v29 = vunpack.i.h.bf16 %v2665_v26  ;;  %v2666_v30 = vunpack.i.l.bf16 %v2665_v26  ;;  %633 = vmatprep.mubr.f32.mxu1 %v543_v27  ;;  %713 = vmatprep.mubr.f32.mxu0 %v543_v27  ;;  %v128_v17 = vld [vmem:[%s4885_s5 + $0x70] sm:$0xff]  ;;  %v3500_v23 = vld [vmem:[%s4885_s5 + $0x1f8] sm:$0xff] }
 0x16f   :  { %634 = vmatmul.mubr.f32.gmra.mxu1 %v531_v28  ;;  %714 = vmatmul.mubr.f32.vlgmr.msra.gmra.mxu0 %v531_v28  ;;  %v125_v24 = vld [vmem:[%s4885_s5 + $0x58] sm:$0xff]  ;;  %v176_v26 = vld [vmem:[%s4885_s5 + $0x1f0] sm:$0xff] }
 0x170   :  { %v536_v33 = vsel %vm519_vm7, %v401_v12, %v2666_v30  ;;  %v522_v34 = vsel %vm519_vm7, %v3334_v41, %v2667_v29  ;;  %v2680_v35 = vpop.permute.xlu1 %2679  ;;  %v494_v41 = vsel %vm394_vm6, %v400_v22, %v493_v40  ;;  %2314 = vmatprep.subr.mxu0 %v3500_v23  ;;  %v161_v25 = vld [vmem:[%s4885_s5 + $0x178] sm:$0xff]  ;;  %v140_v27 = vld [vmem:[%s4885_s5 + $0xd0] sm:$0xff]  ;;  %v175_v30 = vld [vmem:[%s4885_s5 + $0x1e8] sm:$0xff] }
 0x171   :  { %v2675_v39 = vpop.permute.xlu0 %2674  ;;  %v2682_v44 = vunpack.i.h.bf16 %v2680_v35  ;;  %v2681_v45 = vunpack.i.l.bf16 %v2680_v35  ;;  %v540_v46 = vsel %vm524_vm8, %v536_v33, %v2671_v32  ;;  %v527_v49 = vsel %vm524_vm8, %v522_v34, %v2672_v31  ;;  %2315 = vmatpush3.msra.mxu0 %v161_v25  ;;  %v160_v28 = vld [vmem:[%s4885_s5 + $0x170] sm:$0xff]  ;;  %v159_v31 = vld [vmem:[%s4885_s5 + $0x168] sm:$0xff]  ;;  %v174_v12 = vld [vmem:[%s4885_s5 + $0x1e0] sm:$0xff] }
 0x172   :  { %v2677_v42 = vunpack.i.h.bf16 %v2675_v39  ;;  %v2676_v43 = vunpack.i.l.bf16 %v2675_v39  ;;  %v124_v29 = vld [vmem:[%s4885_s5 + $0x50] sm:$0xff]  ;;  %2316 = vmatprep.subr.mxu0 %v176_v26  ;;  %v139_v32 = vld [vmem:[%s4885_s5 + $0xc8] sm:$0xff]  ;;  %v158_v34 = vld [vmem:[%s4885_s5 + $0x160] sm:$0xff] }
 0x173   :  { %v552_v58 = vsel %vm519_vm7, %v494_v41, %v2681_v45  ;;  %v546_v59 = vsel %vm519_vm7, %v3348_v48, %v2682_v44  ;;  %2317 = vmatpush3.msra.mxu0 %v160_v28  ;;  %v123_v33 = vld [vmem:[%s4885_s5 + $0x48] sm:$0xff]  ;;  %v138_v35 = vld [vmem:[%s4885_s5 + $0xc0] sm:$0xff]  ;;  %v173_v39 = vld [vmem:[%s4885_s5 + $0x1d8] sm:$0xff] }
 0x174   :  { %v544_v50 = vsel %vm529_vm9, %v540_v46, %v2676_v43  ;;  %v532_v51 = vsel %vm529_vm9, %v527_v49, %v2677_v42  ;;  %v2690_v52 = vpop.permute.xlu1 %2689  ;;  %2318 = vmatprep.subr.mxu0 %v175_v30  ;;  %v122_v42 = vld [vmem:[%s4885_s5 + $0x40] sm:$0xff]  ;;  %v157_v43 = vld [vmem:[%s4885_s5 + $0x158] sm:$0xff]  ;;  %v172_v45 = vld [vmem:[%s4885_s5 + $0x1d0] sm:$0xff] }
 0x175   :  { %v2685_v53 = vpop.permute.xlu0 %2684  ;;  %638 = vmatprep.mubr.f32.mxu1 %v544_v50  ;;  %718 = vmatprep.mubr.f32.mxu0 %v544_v50  ;;  %v2692_v54 = vunpack.i.h.bf16 %v2690_v52  ;;  %v2691_v55 = vunpack.i.l.bf16 %v2690_v52  ;;  %v137_v44 = vld [vmem:[%s4885_s5 + $0xb8] sm:$0xff]  ;;  %v136_v49 = vld [vmem:[%s4885_s5 + $0xb0] sm:$0xff]  ;;  %v119_v52 = vld [vmem:[%s4885_s5 + $0x28] sm:$0xff] }
 0x176   :  { %v2687_v56 = vunpack.i.h.bf16 %v2685_v53  ;;  %v2686_v57 = vunpack.i.l.bf16 %v2685_v53  ;;  %639 = vmatmul.mubr.f32.gmra.mxu1 %v532_v51  ;;  %719 = vmatmul.mubr.f32.gmra.mxu0 %v532_v51  ;;  %v121_v46 = vld [vmem:[%s4885_s5 + $0x38] sm:$0xff]  ;;  %v120_v50 = vld [vmem:[%s4885_s5 + $0x30] sm:$0xff]  ;;  %v135_v51 = vld [vmem:[%s4885_s5 + $0xa8] sm:$0xff] }
 0x177   :  { %2319 = vmatpush3.msra.mxu0 %v159_v31  ;;  %v134_v53 = vld [vmem:[%s4885_s5 + $0xa0] sm:$0xff] }
 0x178   :  { %v554_v60 = vsel %vm524_vm8, %v552_v58, %v2686_v57  ;;  %v548_v61 = vsel %vm524_vm8, %v546_v59, %v2687_v56  ;;  %v2700_v62 = vpop.permute.xlu1 %2699  ;;  %2320 = vmatprep.subr.mxu0 %v174_v12  ;;  %v118_v41 = vld [vmem:[%s4885_s5 + $0x20] sm:$0xff]  ;;  %v132_v56 = vld [vmem:[%s4885_s5 + $0x90] sm:$0xff]  ;;  %v131_v58 = vld [vmem:[%s4885_s5 + $0x88] sm:$0xff] }
 0x179   :  { %v2695_v1 = vpop.permute.xlu0 %2694  ;;  %v556_v2 = vsel %vm529_vm9, %v554_v60, %v2691_v55  ;;  %v550_v3 = vsel %vm529_vm9, %v548_v61, %v2692_v54  ;;  %v2702_v4 = vunpack.i.h.bf16 %v2700_v62  ;;  %v2701_v5 = vunpack.i.l.bf16 %v2700_v62  ;;  %2321 = vmatpush3.msra.mxu0 %v158_v34  ;;  %v133_v54 = vld [vmem:[%s4885_s5 + $0x98] sm:$0xff]  ;;  %v116_v57 = vld [vmem:[%s4885_s5 + $0x10] sm:$0xff]  ;;  %v154_v28 = vld [vmem:[%s4885_s5 + $0x140] sm:$0xff] }
 0x17a   :  { %v2697_v6 = vunpack.i.h.bf16 %v2695_v1  ;;  %v2696_v7 = vunpack.i.l.bf16 %v2695_v1  ;;  %723 = vmatprep.mubr.f32.mxu0 %v556_v2  ;;  %2322 = vmatprep.subr.mxu0 %v173_v39  ;;  %v168_v34 = vld [vmem:[%s4885_s5 + $0x1b0] sm:$0xff] }
 0x17b   :  { %724 = vmatmul.mubr.f32.gmra.mxu0 %v550_v3  ;;  %v3596_v3 = vld [vmem:[%s4886_s4] ss:$0 sm:$0xff] }
 0x17c   :  { %v537_v0 = vsel %vm519_vm7, %v400_v22, %v2696_v7  ;;  %v523_v8 = vsel %vm519_vm7, %v3348_v48, %v2697_v6  ;;  %v129_v48 = vld [vmem:[%s4885_s5 + $0x78] sm:$0xff]  ;;  %2323 = vmatpush3.msra.mxu0 %v157_v43 }
 0x17d   :  { %v389_v9 = vpop.permute.xlu0 %388  ;;  %v541_v10 = vsel %vm524_vm8, %v537_v0, %v2701_v5  ;;  %v528_v11 = vsel %vm524_vm8, %v523_v8, %v2702_v4  ;;  %2274 = vmatpush3.msra.mxu1 %v129_v48  ;;  %v141_v22 = vld [vmem:[%s4885_s5 + $0xd8] sm:$0xff]  ;;  %2324 = vmatprep.subr.mxu0 %v172_v45 }
 0x17e   :  { %v545_v13 = vsel %vm529_vm9, %v541_v10, %v2691_v55  ;;  %v533_v14 = vsel %vm529_vm9, %v528_v11, %v389_v9  ;;  %2275 = vmatprep.subr.mxu1 %v144_v16  ;;  %v117_v55 = vld [vmem:[%s4885_s5 + $0x18] sm:$0xff]  ;;  %v115_v10 = vld [vmem:[%s4885_s5 + $0x8] sm:$0xff]  ;;  %v156_v11 = vld [vmem:[%s4885_s5 + $0x150] sm:$0xff] }
 0x17f   :  { %643 = vmatprep.mubr.f32.mxu1 %v545_v13  ;;  %2276 = vmatpush3.msra.mxu1 %v128_v17  ;;  %v130_v13 = vld [vmem:[%s4885_s5 + $0x80] sm:$0xff]  ;;  %v171_v16 = vld [vmem:[%s4885_s5 + $0x1c8] sm:$0xff] }
 0x180   :  { %644 = vmatmul.mubr.f32.gmra.mxu1 %v533_v14  ;;  %2277 = vmatprep.subr.mxu1 %v143_v19  ;;  %v114_v17 = vld [vmem:[%s4885_s5] sm:$0xff] }
 0x181   :  { %2278 = vmatpush3.msra.mxu1 %v127_v20  ;;  %2325 = vmatpush3.msra.mxu0 %v156_v11 }
 0x182   :  { %2279 = vmatprep.subr.mxu1 %v142_v18  ;;  %2326 = vmatprep.subr.mxu0 %v171_v16  ;;  %v155_v18 = vld [vmem:[%s4885_s5 + $0x148] sm:$0xff] }
 0x183   :  { %2280 = vmatpush3.msra.mxu1 %v126_v21  ;;  %v170_v21 = vld [vmem:[%s4885_s5 + $0x1c0] sm:$0xff]  ;;  %2327 = vmatpush3.msra.mxu0 %v155_v18 }
 0x184   :  { %2281 = vmatprep.subr.mxu1 %v141_v22  ;;  %2328 = vmatprep.subr.mxu0 %v170_v21 }
 0x185   :  { %2282 = vmatpush3.msra.mxu1 %v125_v24  ;;  %2329 = vmatpush3.msra.mxu0 %v154_v28 }
 0x186   :  { %2283 = vmatprep.subr.mxu1 %v140_v27  ;;  %v3626_v27 = vld [vmem:[%s4881_s1 + $0x78] sm:$0xff] }
 0x187   :  { %2284 = vmatpush3.msra.mxu1 %v124_v29  ;;  %v169_v29 = vld [vmem:[%s4885_s5 + $0x1b8] sm:$0xff] }
 0x188   :  { %2285 = vmatprep.subr.mxu1 %v139_v32  ;;  %2330 = vmatprep.subr.mxu0 %v169_v29  ;;  %v153_v32 = vld [vmem:[%s4885_s5 + $0x138] sm:$0xff] }
 0x189   :  { %2286 = vmatpush3.msra.mxu1 %v123_v33  ;;  %2331 = vmatpush3.msra.mxu0 %v153_v32 }
 0x18a   :  { %2287 = vmatprep.subr.mxu1 %v138_v35  ;;  %2332 = vmatprep.subr.mxu0 %v168_v34  ;;  %v2867_v34 = vld [vmem:[%s4881_s1 + $0x70] sm:$0xff] }
 0x18b   :  { %2288 = vmatpush3.msra.mxu1 %v122_v42 }
 0x18c   :  { %2289 = vmatprep.subr.mxu1 %v137_v44  ;;  %v152_v44 = vld [vmem:[%s4885_s5 + $0x130] sm:$0xff] }
 0x18d   :  { %2290 = vmatpush3.msra.mxu1 %v121_v46  ;;  %2333 = vmatpush3.msra.mxu0 %v152_v44 }
 0x18e   :  { %2291 = vmatprep.subr.mxu1 %v136_v49 }
 0x18f   :  { %2292 = vmatpush3.msra.mxu1 %v120_v50  ;;  %v167_v50 = vld [vmem:[%s4885_s5 + $0x1a8] sm:$0xff] }
 0x190   :  { %2293 = vmatprep.subr.mxu1 %v135_v51  ;;  %v151_v51 = vld [vmem:[%s4885_s5 + $0x128] sm:$0xff]  ;;  %2334 = vmatprep.subr.mxu0 %v167_v50 }
 0x191   :  { %2294 = vmatpush3.msra.mxu1 %v119_v52  ;;  %2335 = vmatpush3.msra.mxu0 %v151_v51 }
 0x192   :  { %2295 = vmatprep.subr.mxu1 %v134_v53 }
 0x193   :  { %2296 = vmatpush3.msra.mxu1 %v118_v41  ;;  %v166_v41 = vld [vmem:[%s4885_s5 + $0x1a0] sm:$0xff] }
 0x194   :  { %2297 = vmatprep.subr.mxu1 %v133_v54  ;;  %v150_v54 = vld [vmem:[%s4885_s5 + $0x120] sm:$0xff]  ;;  %2336 = vmatprep.subr.mxu0 %v166_v41 }
 0x195   :  { %2298 = vmatpush3.msra.mxu1 %v117_v55  ;;  %2337 = vmatpush3.msra.mxu0 %v150_v54  ;;  %v2869_v41 = vld [vmem:[%s4881_s1 + $0x60] sm:$0xff] }
 0x196   :  { %2299 = vmatprep.subr.mxu1 %v132_v56 }
 0x197   :  { %2300 = vmatpush3.msra.mxu1 %v116_v57  ;;  %v165_v57 = vld [vmem:[%s4885_s5 + $0x198] sm:$0xff] }
 0x198   :  { %2301 = vmatprep.subr.mxu1 %v131_v58  ;;  %v149_v58 = vld [vmem:[%s4885_s5 + $0x118] sm:$0xff]  ;;  %2338 = vmatprep.subr.mxu0 %v165_v57 }
 0x199   :  { %2302 = vmatpush3.msra.mxu1 %v115_v10  ;;  %2339 = vmatpush3.msra.mxu0 %v149_v58 }
 0x19a   :  { %2303 = vmatprep.subr.mxu1 %v130_v13  ;;  %v146_v13 = vld [vmem:[%s4885_s5 + $0x100] sm:$0xff] }
 0x19b   :  { %2304 = vmatpush3.msra.mxu1 %v114_v17 }
 0x19c   :  { %2588 = vmatprep.subr.mxu1 %v3626_v27 }
 0x22b   :  { %v2217_v59 = vpop.f32.mrf.mxu1 }
 0x22d   :  { %v2218_v60 = vpop.f32.mrf.mxu1 }
 0x22e   :  { %v2219_v1 = vadd.f32 %v2218_v60, %v2217_v59 }
 0x22f   :  { %v2220_v61 = vpop.f32.mrf.mxu1  ;;  %v2261_v62 = vpop.f32.mrf.mxu0 }
 0x230   :  { %v631_v6 = vadd.f32 %v2219_v1, %v3596_v3 }
 0x231   :  { %v2262_v2 = vpop.f32.mrf.mxu0  ;;  %v2221_v4 = vpop.f32.mrf.mxu1 }
 0x232   :  { %v2263_v5 = vadd.f32 %v2262_v2, %v2261_v62  ;;  %v2222_v7 = vadd.f32 %v2221_v4, %v2220_v61  ;;  %v164_v61 = vld [vmem:[%s4885_s5 + $0x190] sm:$0xff] }
 0x233   :  { %v148_v4 = vld [vmem:[%s4885_s5 + $0x110] sm:$0xff]  ;;  %2340 = vmatprep.subr.mxu0 %v164_v61 }
 0x234   :  { %v716_v9 = vadd.f32 %v2263_v5, %v631_v6  ;;  %v636_v19 = vadd.f32 %v2222_v7, %v3596_v3  ;;  %v163_v5 = vld [vmem:[%s4885_s5 + $0x188] sm:$0xff]  ;;  %2341 = vmatpush3.msra.mxu0 %v148_v4  ;;  %v2138_v61 = vld [vmem:[%s4882_s0 + $0x30] sm:$0xff] }
 0x235   :  { %2342 = vmatprep.subr.mxu0 %v163_v5 }
 0x236   :  { %v2223_v0 = vpop.f32.mrf.mxu1  ;;  %v2264_v8 = vpop.f32.mrf.mxu0  ;;  %v3621_v24 = vmax.f32 %v716_v9, 0.0 }
 0x238   :  { %v2224_v14 = vpop.f32.mrf.mxu1  ;;  %v2265_v48 = vpop.f32.mrf.mxu0  ;;  %v741_v35 = vrot.slane %v3621_v24, 1  ;;  %v763_v42 = vrot.slane %v3621_v24, 3  ;;  %v785_v6 = vrot.slane %v3621_v24, 5  ;;  %v810_v7 = vrot.slane %v3621_v24, 7 }
 0x239   :  { %v2266_v20 = vadd.f32 %v2265_v48, %v2264_v8  ;;  %v2225_v22 = vadd.f32 %v2224_v14, %v2223_v0  ;;  %v147_v0 = vld [vmem:[%s4885_s5 + $0x108] sm:$0xff]  ;;  %v2866_v48 = vld [vmem:[%s4883_s3 + $0xf8] sm:$0xff]  ;;  %v755_v21 = vrot.slane %v3621_v24, 2 }
 0x23a   :  { %2343 = vmatpush3.msra.mxu0 %v147_v0 }
 0x23b   :  { %v721_v25 = vadd.f32 %v2266_v20, %v636_v19  ;;  %v2267_v26 = vpop.f32.mrf.mxu0  ;;  %v641_v12 = vadd.f32 %v2225_v22, %v3596_v3 }
 0x23d   :  { %v3635_v30 = vmax.f32 %v721_v25, 0.0  ;;  %v2268_v31 = vpop.f32.mrf.mxu0 }
 0x23e   :  { %v2269_v33 = vadd.f32 %v2268_v31, %v2267_v26 }
 0x23f   :  { %v742_v39 = vrot.slane %v3635_v30, 1  ;;  %v764_v43 = vrot.slane %v3635_v30, 3  ;;  %v786_v1 = vrot.slane %v3635_v30, 5  ;;  %v811_v2 = vrot.slane %v3635_v30, 7 }
 0x240   :  { %v726_v45 = vadd.f32 %v2269_v33, %v641_v12  ;;  %v756_v20 = vrot.slane %v3635_v30, 2 }
 0x241   :  { %v743_v46 = vsel %vm334_vm2, %v741_v35, %v742_v39  ;;  %v765_v49 = vsel %vm374_vm0, %v763_v42, %v764_v43  ;;  %v787_v10 = vsel %vm406_vm3, %v785_v6, %v786_v1  ;;  %v812_v11 = vsel %vm447_vm1, %v810_v7, %v811_v2 }
 0x242   :  { %v3659_v52 = vmax.f32 %v726_v45, 0.0  ;;  %v2703_v53 = vpack.i.bf16 %v743_v46, %v765_v49  ;;  %v757_v26 = vsel %vm354_vm4, %v755_v21, %v756_v20  ;;  %v800_v6 = vrot.slane %v3621_v24, 6 }
 0x244   :  { %2704 = vrot.lane.b32.xlu1 %v2703_v53, %s3012_s17  ;;  %v744_v55 = vrot.slane %v3659_v52, 1  ;;  %v766_v56 = vrot.slane %v3659_v52, 3  ;;  %v813_v14 = vrot.slane %v3659_v52, 7  ;;  %v758_v31 = vrot.slane %v3659_v52, 2 }
 0x246   :  { %v745_v59 = vsel %vm334_vm2, %v742_v39, %v744_v55  ;;  %v767_v60 = vsel %vm374_vm0, %v764_v43, %v766_v56  ;;  %v2723_v8 = vpack.i.bf16 %v477_v36, %v744_v55  ;;  %v2718_v9 = vpack.i.bf16 %v505_v37, %v766_v56  ;;  %v2870_v56 = vld [vmem:[%s4881_s1 + $0x58] sm:$0xff] }
 0x247   :  { %v2713_v62 = vpack.i.bf16 %v745_v59, %v767_v60  ;;  %v788_v36 = vrot.slane %v3659_v52, 5  ;;  %v2733_v37 = vpack.i.bf16 %v787_v10, %v812_v11  ;;  %v814_v17 = vsel %vm447_vm1, %v811_v2, %v813_v14 }
 0x248   :  { %2709 = vrot.lane.b32.xlu1 %v3401_v38, %s3011_s16  ;;  %v162_v38 = vld [vmem:[%s4885_s5 + $0x180] sm:$0xff]  ;;  %v759_v35 = vsel %vm354_vm4, %v756_v20, %v758_v31  ;;  %v801_v60 = vrot.slane %v3635_v30, 6 }
 0x249   :  { %2714 = vrot.lane.b32.xlu0 %v2713_v62, %s3012_s17  ;;  %2344 = vmatprep.subr.mxu0 %v162_v38  ;;  %v789_v16 = vsel %vm406_vm3, %v786_v1, %v788_v36 }
 0x24a   :  { %2345 = vmatpush3.msra.mxu0 %v146_v13  ;;  %v2738_v19 = vpack.i.bf16 %v789_v16, %v814_v17  ;;  %v802_v11 = vsel %vm426_vm5, %v800_v6, %v801_v60  ;;  %v803_v13 = vrot.slane %v3659_v52, 6  ;;  %v2873_v16 = vld [vmem:[%s4881_s1 + $0x40] sm:$0xff]  ;;  %v2906_v6 = vld [vmem:[%s4883_s3 + $0x38] sm:$0xff] }
 0x24b   :  { %2377 = vmatprep.subr.mxu0 %v2866_v48 }
 0x24c   :  { %2724 = vrot.lane.b32.xlu1 %v2723_v8, %s3012_s17  ;;  %v778_v8 = vrot.slane %v3635_v30, 4 }
 0x24d   :  { %2719 = vrot.lane.b32.xlu0 %v2718_v9, %s3012_s17  ;;  %v2872_v9 = vld [vmem:[%s4881_s1 + $0x48] sm:$0xff] }
 0x250   :  { %2734 = vrot.lane.b32.xlu1 %v2733_v37, %s3012_s17 }
 0x251   :  { %2729 = vrot.lane.b32.xlu0 %v3412_v47, %s3010_s13 }
 0x255   :  { %2739 = vrot.lane.b32.xlu0 %v2738_v19, %s3012_s17  ;;  %v780_v19 = vrot.slane %v3659_v52, 4 }
 0x2b6   :  { %v2705_v18 = vpop.permute.xlu1 %2704 }
 0x2b7   :  { %v2707_v22 = vunpack.i.h.bf16 %v2705_v18  ;;  %v2706_v25 = vunpack.i.l.bf16 %v2705_v18  ;;  %v2874_v18 = vld [vmem:[%s4881_s1 + $0x38] sm:$0xff] }
 0x2b9   :  { %v829_v28 = vsel %vm524_vm8, %v757_v26, %v2706_v25  ;;  %v826_v29 = vsel %vm524_vm8, %v3621_v24, %v2707_v22  ;;  %v2875_v25 = vld [vmem:[%s4881_s1 + $0x30] sm:$0xff]  ;;  %v781_v26 = vsel %vm394_vm6, %v778_v8, %v780_v19 }
 0x2ba   :  { %v2710_v47 = vpop.permute.xlu1 %2709  ;;  %908 = vmatprep.mubr.f32.mxu1 %v829_v28  ;;  %v2876_v28 = vld [vmem:[%s4883_s3 + $0x78] sm:$0xff] }
 0x2bb   :  { %v2715_v32 = vpop.permute.xlu0 %2714  ;;  %909 = vmatmul.mubr.f32.vlgmr.msra.gmra.mxu1 %v826_v29  ;;  %v2712_v44 = vunpack.i.h.bf16 %v2710_v47  ;;  %v2711_v45 = vunpack.i.l.bf16 %v2710_v47  ;;  %v2877_v29 = vld [vmem:[%s4881_s1 + $0x28] sm:$0xff]  ;;  %v2878_v47 = vld [vmem:[%s4883_s3 + $0xf0] sm:$0xff] }
 0x2bc   :  { %v2717_v12 = vunpack.i.h.bf16 %v2715_v32  ;;  %v2716_v33 = vunpack.i.l.bf16 %v2715_v32  ;;  %2589 = vmatpush3.msra.mxu1 %v3626_v27  ;;  %v2868_v27 = vld [vmem:[%s4881_s1 + $0x68] sm:$0xff]  ;;  %v2879_v32 = vld [vmem:[%s4881_s1 + $0x20] sm:$0xff] }
 0x2bd   :  { %2590 = vmatprep.subr.mxu1 %v2867_v34  ;;  %v553_v58 = vsel %vm519_vm7, %v493_v40, %v2711_v45  ;;  %v547_v59 = vsel %vm519_vm7, %v3364_v63, %v2712_v44  ;;  %v2871_v40 = vld [vmem:[%s4881_s1 + $0x50] sm:$0xff]  ;;  %v2887_v44 = vld [vmem:[%s4883_s3 + $0xd8] sm:$0xff]  ;;  %v2888_v45 = vld [vmem:[%s4881_s1 + $0x8] sm:$0xff] }
 0x2be   :  { %2591 = vmatpush3.msra.mxu1 %v2867_v34  ;;  %v2725_v39 = vpop.permute.xlu1 %2724  ;;  %v830_v42 = vsel %vm524_vm8, %v759_v35, %v2716_v33  ;;  %v827_v43 = vsel %vm524_vm8, %v3635_v30, %v2717_v12  ;;  %v777_v30 = vrot.slane %v3621_v24, 4  ;;  %v804_v24 = vsel %vm426_vm5, %v801_v60, %v803_v13  ;;  %v2880_v12 = vld [vmem:[%s4883_s3 + $0x70] sm:$0xff]  ;;  %v2881_v33 = vld [vmem:[%s4883_s3 + $0xe8] sm:$0xff]  ;;  %v2882_v34 = vld [vmem:[%s4881_s1 + $0x18] sm:$0xff] }
 0x2bf   :  { %2592 = vmatprep.subr.mxu1 %v2868_v27  ;;  %v2720_v46 = vpop.permute.xlu0 %2719  ;;  %913 = vmatprep.mubr.f32.mxu1 %v830_v42  ;;  %v2726_v49 = vunpack.i.l.bf16 %v2725_v39  ;;  %v2727_v51 = vunpack.i.h.bf16 %v2725_v39  ;;  %v2883_v35 = vld [vmem:[%s4883_s3 + $0x68] sm:$0xff]  ;;  %v2884_v39 = vld [vmem:[%s4883_s3 + $0xe0] sm:$0xff]  ;;  %v2885_v42 = vld [vmem:[%s4881_s1 + $0x10] sm:$0xff] }
 0x2c0   :  { %v2721_v50 = vunpack.i.l.bf16 %v2720_v46  ;;  %2593 = vmatpush3.msra.mxu1 %v2868_v27  ;;  %v2722_v53 = vunpack.i.h.bf16 %v2720_v46  ;;  %v779_v17 = vsel %vm394_vm6, %v777_v30, %v778_v8  ;;  %v2889_v27 = vld [vmem:[%s4883_s3 + $0x58] sm:$0xff]  ;;  %v2898_v60 = vld [vmem:[%s4883_s3 + $0x170] sm:$0xff]  ;;  %v2916_v30 = vld [vmem:[%s4883_s3 + $0xa0] sm:$0xff] }
 0x2c1   :  { %914 = vmatmul.mubr.f32.gmra.mxu1 %v827_v43  ;;  %2594 = vmatprep.subr.mxu1 %v2869_v41  ;;  %v828_v4 = vsel %vm524_vm8, %v3659_v52, %v2726_v49  ;;  %v549_v5 = vsel %vm524_vm8, %v547_v59, %v2727_v51  ;;  %v2886_v43 = vld [vmem:[%s4883_s3 + $0x60] sm:$0xff]  ;;  %v2139_v46 = vld [vmem:[%s4882_s0 + $0x38] sm:$0xff]  ;;  %v2890_v49 = vld [vmem:[%s4883_s3 + $0xd0] sm:$0xff] }
 0x2c2   :  { %2595 = vmatpush3.msra.mxu1 %v2869_v41  ;;  %v2735_v54 = vpop.permute.xlu1 %2734  ;;  %v831_v55 = vsel %vm524_vm8, %v758_v31, %v2721_v50  ;;  %v555_v63 = vsel %vm524_vm8, %v553_v58, %v2722_v53  ;;  %v2891_v50 = vld [vmem:[%s4881_s1] sm:$0xff]  ;;  %v2892_v53 = vld [vmem:[%s4883_s3 + $0x50] sm:$0xff]  ;;  %v2893_v41 = vld [vmem:[%s4883_s3 + $0xc8] sm:$0xff] }
 0x2c3   :  { %2596 = vmatprep.subr.mxu1 %v2870_v56  ;;  %v2730_v57 = vpop.permute.xlu0 %2729  ;;  %918 = vmatprep.mubr.f32.mxu1 %v831_v55  ;;  %v2736_v62 = vunpack.i.l.bf16 %v2735_v54  ;;  %v2737_v38 = vunpack.i.h.bf16 %v2735_v54  ;;  %v2140_v51 = vld [vmem:[%s4882_s0 + $0x40] sm:$0xff]  ;;  %v2894_v54 = vld [vmem:[%s4883_s3 + $0x1f8] sm:$0xff]  ;;  %v2141_v55 = vld [vmem:[%s4882_s0 + $0x48] sm:$0xff] }
 0x2c4   :  { %v2732_v1 = vunpack.i.h.bf16 %v2730_v57  ;;  %v2731_v2 = vunpack.i.l.bf16 %v2730_v57  ;;  %2597 = vmatpush3.msra.mxu1 %v2870_v56  ;;  %v2895_v56 = vld [vmem:[%s4883_s3 + $0x178] sm:$0xff]  ;;  %v2142_v57 = vld [vmem:[%s4882_s0 + $0x50] sm:$0xff]  ;;  %v2897_v59 = vld [vmem:[%s4883_s3 + $0x48] sm:$0xff] }
 0x2c5   :  { %919 = vmatmul.mubr.f32.gmra.mxu1 %v828_v4  ;;  %2598 = vmatprep.subr.mxu1 %v2871_v40  ;;  %v835_v48 = vsel %vm524_vm8, %v802_v11, %v2736_v62  ;;  %v832_v21 = vsel %vm524_vm8, %v779_v17, %v2737_v38  ;;  %v2896_v58 = vld [vmem:[%s4883_s3 + $0x1f0] sm:$0xff]  ;;  %v2900_v62 = vld [vmem:[%s4883_s3 + $0x1e8] sm:$0xff]  ;;  %v2902_v4 = vld [vmem:[%s4883_s3 + $0x40] sm:$0xff] }
 0x2c6   :  { %2599 = vmatpush3.msra.mxu1 %v2871_v40  ;;  %v557_v7 = vsel %vm529_vm9, %v555_v63, %v2731_v2  ;;  %v551_v0 = vsel %vm529_vm9, %v549_v5, %v2732_v1  ;;  %2620 = vmatprep.mubr.f32.mxu1 %v2138_v61  ;;  %v2899_v61 = vld [vmem:[%s4883_s3 + $0xc0] sm:$0xff]  ;;  %v2143_v1 = vld [vmem:[%s4882_s0 + $0x58] sm:$0x1]  ;;  %v2901_v2 = vld [vmem:[%s4883_s3 + $0x168] sm:$0xff] }
 0x2c7   :  { %2600 = vmatprep.subr.mxu1 %v2872_v9  ;;  %v2740_v10 = vpop.permute.xlu0 %2739  ;;  %728 = vmatprep.mubr.f32.mxu0 %v557_v7  ;;  %v2903_v40 = vld [vmem:[%s4883_s3 + $0x1e0] sm:$0xff]  ;;  %v2904_v63 = vld [vmem:[%s4883_s3 + $0xb8] sm:$0xff]  ;;  %v2910_v38 = vld [vmem:[%s4883_s3 + $0x30] sm:$0xff] }
 0x2c8   :  { %v2741_v37 = vunpack.i.l.bf16 %v2740_v10  ;;  %2601 = vmatpush3.msra.mxu1 %v2872_v9  ;;  %729 = vmatmul.mubr.f32.gmra.mxu0 %v551_v0  ;;  %v2742_v20 = vunpack.i.h.bf16 %v2740_v10  ;;  %v2905_v5 = vld [vmem:[%s4883_s3 + $0x160] sm:$0xff]  ;;  %v2907_v7 = vld [vmem:[%s4883_s3 + $0x1d8] sm:$0xff]  ;;  %v2908_v0 = vld [vmem:[%s4883_s3 + $0xb0] sm:$0xff] }
 0x2c9   :  { %2602 = vmatprep.subr.mxu1 %v2873_v16  ;;  %988 = vmatprep.mubr.f32.mxu0 %v835_v48  ;;  %v2909_v8 = vld [vmem:[%s4883_s3 + $0x158] sm:$0xff]  ;;  %v2911_v9 = vld [vmem:[%s4883_s3 + $0x1d0] sm:$0xff]  ;;  %v2912_v10 = vld [vmem:[%s4883_s3 + $0xa8] sm:$0xff] }
 0x2ca   :  { %2603 = vmatpush3.msra.mxu1 %v2873_v16  ;;  %v836_v22 = vsel %vm524_vm8, %v804_v24, %v2741_v37  ;;  %v833_v31 = vsel %vm524_vm8, %v781_v26, %v2742_v20  ;;  %v2913_v11 = vld [vmem:[%s4883_s3 + $0x150] sm:$0xff]  ;;  %v2914_v37 = vld [vmem:[%s4883_s3 + $0x28] sm:$0xff]  ;;  %v2918_v17 = vld [vmem:[%s4883_s3 + $0x20] sm:$0xff] }
 0x2cb   :  { %2604 = vmatprep.subr.mxu1 %v2874_v18  ;;  %v2915_v48 = vld [vmem:[%s4883_s3 + $0x1c8] sm:$0xff]  ;;  %v2919_v20 = vld [vmem:[%s4883_s3 + $0x1c0] sm:$0xff]  ;;  %v2922_v24 = vld [vmem:[%s4883_s3 + $0x18] sm:$0xff] }
 0x2cc   :  { %2605 = vmatpush3.msra.mxu1 %v2874_v18  ;;  %989 = vmatmul.mubr.f32.vlgmr.msra.gmra.mxu0 %v832_v21  ;;  %v2917_v16 = vld [vmem:[%s4883_s3 + $0x148] sm:$0xff]  ;;  %v2920_v18 = vld [vmem:[%s4883_s3 + $0x98] sm:$0xff]  ;;  %v2921_v21 = vld [vmem:[%s4883_s3 + $0x140] sm:$0xff] }
 0x2cd   :  { %2606 = vmatprep.subr.mxu1 %v2875_v25  ;;  %993 = vmatprep.mubr.f32.mxu0 %v836_v22  ;;  %v2923_v22 = vld [vmem:[%s4883_s3 + $0x1b8] sm:$0xff] }
 0x2ce   :  { %2607 = vmatpush3.msra.mxu1 %v2875_v25  ;;  %2378 = vmatpush3.msra.mxu0 %v2876_v28  ;;  %v2924_v25 = vld [vmem:[%s4883_s3 + $0x90] sm:$0xff]  ;;  %v2925_v26 = vld [vmem:[%s4883_s3 + $0x138] sm:$0xff] }
 0x2cf   :  { %2608 = vmatprep.subr.mxu1 %v2877_v29  ;;  %2379 = vmatprep.subr.mxu0 %v2878_v47  ;;  %v2926_v28 = vld [vmem:[%s4883_s3 + $0x10] sm:$0xff] }
 0x2d0   :  { %2609 = vmatpush3.msra.mxu1 %v2877_v29  ;;  %994 = vmatmul.mubr.f32.gmra.mxu0 %v833_v31  ;;  %v2927_v29 = vld [vmem:[%s4883_s3 + $0x1b0] sm:$0xff]  ;;  %v2928_v31 = vld [vmem:[%s4883_s3 + $0x88] sm:$0xff] }
 0x2d1   :  { %2610 = vmatprep.subr.mxu1 %v2879_v32  ;;  %2380 = vmatpush3.msra.mxu0 %v2880_v12  ;;  %v2929_v47 = vld [vmem:[%s4883_s3 + $0x130] sm:$0xff]  ;;  %v2931_v12 = vld [vmem:[%s4883_s3 + $0x1a8] sm:$0xff] }
 0x2d2   :  { %2611 = vmatpush3.msra.mxu1 %v2879_v32  ;;  %2381 = vmatprep.subr.mxu0 %v2881_v33  ;;  %v2930_v32 = vld [vmem:[%s4883_s3 + $0x8] sm:$0xff]  ;;  %v2932_v33 = vld [vmem:[%s4883_s3 + $0x80] sm:$0xff] }
 0x2d3   :  { %2612 = vmatprep.subr.mxu1 %v2882_v34  ;;  %2382 = vmatpush3.msra.mxu0 %v2883_v35  ;;  %v2934_v35 = vld [vmem:[%s4883_s3] sm:$0xff] }
 0x2d4   :  { %2613 = vmatpush3.msra.mxu1 %v2882_v34  ;;  %2383 = vmatprep.subr.mxu0 %v2884_v39  ;;  %v2933_v34 = vld [vmem:[%s4883_s3 + $0x128] sm:$0xff]  ;;  %v2935_v39 = vld [vmem:[%s4883_s3 + $0x1a0] sm:$0xff] }
 0x2d5   :  { %2614 = vmatprep.subr.mxu1 %v2885_v42  ;;  %2384 = vmatpush3.msra.mxu0 %v2886_v43  ;;  %v2937_v43 = vld [vmem:[%s4883_s3 + $0x198] sm:$0xff] }
 0x2d6   :  { %2615 = vmatpush3.msra.mxu1 %v2885_v42  ;;  %2385 = vmatprep.subr.mxu0 %v2887_v44  ;;  %v2936_v42 = vld [vmem:[%s4883_s3 + $0x120] sm:$0xff]  ;;  %v2938_v44 = vld [vmem:[%s4883_s3 + $0x118] sm:$0xff] }
 0x2d7   :  { %2616 = vmatprep.subr.mxu1 %v2888_v45  ;;  %2386 = vmatpush3.msra.mxu0 %v2889_v27  ;;  %v2941_v27 = vld [vmem:[%s4883_s3 + $0x188] sm:$0xff] }
 0x2d8   :  { %2617 = vmatpush3.msra.mxu1 %v2888_v45  ;;  %2387 = vmatprep.subr.mxu0 %v2890_v49  ;;  %v2939_v45 = vld [vmem:[%s4883_s3 + $0x190] sm:$0xff]  ;;  %v2943_v49 = vld [vmem:[%s4883_s3 + $0x180] sm:$0xff] }
 0x2d9   :  { %2618 = vmatprep.subr.mxu1 %v2891_v50  ;;  %2388 = vmatpush3.msra.mxu0 %v2892_v53 }
 0x2da   :  { %2619 = vmatpush3.msra.mxu1 %v2891_v50  ;;  %2389 = vmatprep.subr.mxu0 %v2893_v41  ;;  %v2944_v50 = vld [vmem:[%s4883_s3 + $0x100] sm:$0xff] }
 0x2db   :  { %2621 = vmatmul.mubr.f32.vlgmr.msra.gmra.mxu1 %v2139_v46  ;;  %2421 = vmatprep.subr.mxu1 %v2894_v54  ;;  %v2942_v46 = vld [vmem:[%s4883_s3 + $0x108] sm:$0xff] }
 0x2dc   :  { %2623 = vmatprep.mubr.f32.mxu1 %v2140_v51  ;;  %2422 = vmatpush3.msra.mxu1 %v2895_v56  ;;  %v2226_v51 = vpop.f32.mrf.mxu1 }
 0x2dd   :  { %2423 = vmatprep.subr.mxu1 %v2896_v58  ;;  %2390 = vmatpush3.msra.mxu0 %v2897_v59 }
 0x2de   :  { %2424 = vmatpush3.msra.mxu1 %v2898_v60  ;;  %2391 = vmatprep.subr.mxu0 %v2899_v61  ;;  %v2227_v53 = vpop.f32.mrf.mxu1 }
 0x2df   :  { %2624 = vmatmul.mubr.f32.gmra.mxu1 %v2141_v55  ;;  %2425 = vmatprep.subr.mxu1 %v2900_v62  ;;  %v2228_v60 = vadd.f32 %v2227_v53, %v2226_v51 }
 0x2e0   :  { %2626 = vmatprep.mubr.f32.mxu1 %v2142_v57  ;;  %2426 = vmatpush3.msra.mxu1 %v2901_v2 }
 0x2e1   :  { %2392 = vmatpush3.msra.mxu0 %v2902_v4  ;;  %2427 = vmatprep.subr.mxu1 %v2903_v40  ;;  %v646_v4 = vadd.f32 %v2228_v60, %v3596_v3 }
 0x2e2   :  { %2393 = vmatprep.subr.mxu0 %v2904_v63  ;;  %2428 = vmatpush3.msra.mxu1 %v2905_v5 }
 0x2e3   :  { %2627 = vmatmul.mubr.f32.gmra.mxu1 %v2143_v1  ;;  %2394 = vmatpush3.msra.mxu0 %v2906_v6 }
 0x2e4   :  { %2429 = vmatprep.subr.mxu1 %v2907_v7  ;;  %2395 = vmatprep.subr.mxu0 %v2908_v0 }
 0x2e5   :  { %2430 = vmatpush3.msra.mxu1 %v2909_v8  ;;  %2396 = vmatpush3.msra.mxu0 %v2910_v38 }
 0x2e6   :  { %2431 = vmatprep.subr.mxu1 %v2911_v9  ;;  %2397 = vmatprep.subr.mxu0 %v2912_v10 }
 0x2e7   :  { %2432 = vmatpush3.msra.mxu1 %v2913_v11  ;;  %2398 = vmatpush3.msra.mxu0 %v2914_v37 }
 0x2e8   :  { %2433 = vmatprep.subr.mxu1 %v2915_v48  ;;  %2399 = vmatprep.subr.mxu0 %v2916_v30 }
 0x2e9   :  { %2434 = vmatpush3.msra.mxu1 %v2917_v16  ;;  %2400 = vmatpush3.msra.mxu0 %v2918_v17 }
 0x2ea   :  { %2435 = vmatprep.subr.mxu1 %v2919_v20  ;;  %2401 = vmatprep.subr.mxu0 %v2920_v18 }
 0x2eb   :  { %2436 = vmatpush3.msra.mxu1 %v2921_v21  ;;  %2402 = vmatpush3.msra.mxu0 %v2922_v24  ;;  %v2945_v24 = vld [vmem:[%s4884_s2] ss:$0 sm:$0xff] }
 0x2ec   :  { %2437 = vmatprep.subr.mxu1 %v2923_v22  ;;  %2403 = vmatprep.subr.mxu0 %v2924_v25 }
 0x2ed   :  { %2438 = vmatpush3.msra.mxu1 %v2925_v26  ;;  %2404 = vmatpush3.msra.mxu0 %v2926_v28 }
 0x2ee   :  { %2439 = vmatprep.subr.mxu1 %v2927_v29  ;;  %2405 = vmatprep.subr.mxu0 %v2928_v31 }
 0x2ef   :  { %2440 = vmatpush3.msra.mxu1 %v2929_v47  ;;  %2406 = vmatpush3.msra.mxu0 %v2930_v32 }
 0x2f0   :  { %2441 = vmatprep.subr.mxu1 %v2931_v12  ;;  %2407 = vmatprep.subr.mxu0 %v2932_v33 }
 0x2f1   :  { %2442 = vmatpush3.msra.mxu1 %v2933_v34  ;;  %2408 = vmatpush3.msra.mxu0 %v2934_v35 }
 0x2f2   :  { %2443 = vmatprep.subr.mxu1 %v2935_v39  ;;  %2465 = vmatprep.subr.mxu0 %v3470_v15  ;;  %v2940_v15 = vld [vmem:[%s4883_s3 + $0x110] sm:$0xff] }
 0x2f3   :  { %2444 = vmatpush3.msra.mxu1 %v2936_v42 }
 0x2f4   :  { %2445 = vmatprep.subr.mxu1 %v2937_v43 }
 0x2f5   :  { %2446 = vmatpush3.msra.mxu1 %v2938_v44 }
 0x2f6   :  { %2447 = vmatprep.subr.mxu1 %v2939_v45 }
 0x2f7   :  { %2448 = vmatpush3.msra.mxu1 %v2940_v15 }
 0x2f8   :  { %2449 = vmatprep.subr.mxu1 %v2941_v27 }
 0x2f9   :  { %2450 = vmatpush3.msra.mxu1 %v2942_v46 }
 0x2fa   :  { %2451 = vmatprep.subr.mxu1 %v2943_v49 }
 0x2fb   :  { %2452 = vmatpush3.msra.mxu1 %v2944_v50 }
 0x2fc   :  { %2506 = vmatprep.subr.mxu1 %v3500_v23  ;;  %v4028_v23 = vld [vmem:[%s4887_s6] ss:$0 sm:$0xff] }
 0x37b   :  { %v2305_v41 = vpop.f32.mrf.mxu1 }
 0x37d   :  { %v2306_v54 = vpop.f32.mrf.mxu1 }
 0x37e   :  { %v2307_v55 = vadd.f32 %v2306_v54, %v2305_v41 }
 0x380   :  { %v911_v7 = vadd.f32 %v2307_v55, %v4028_v23 }
 0x381   :  { %v2308_v56 = vpop.f32.mrf.mxu1 }
 0x383   :  { %v2309_v57 = vpop.f32.mrf.mxu1 }
 0x384   :  { %v2310_v58 = vadd.f32 %v2309_v57, %v2308_v56 }
 0x385   :  { %v2311_v59 = vpop.f32.mrf.mxu1 }
 0x386   :  { %v916_v11 = vadd.f32 %v2310_v58, %v4028_v23 }
 0x387   :  { %v2312_v61 = vpop.f32.mrf.mxu1 }
 0x388   :  { %v4022_v62 = vadd.f32 %v2312_v61, %v2311_v59  ;;  %v2270_v1 = vpop.f32.mrf.mxu0 }
 0x38a   :  { %v2271_v2 = vpop.f32.mrf.mxu0 }
 0x38b   :  { %v2272_v40 = vadd.f32 %v2271_v2, %v2270_v1 }
 0x38c   :  { %v2346_v63 = vpop.f32.mrf.mxu0 }
 0x38d   :  { %v4030_v5 = vadd.f32 %v2272_v40, %v646_v4 }
 0x38e   :  { %v2347_v6 = vpop.f32.mrf.mxu0 }
 0x38f   :  { %v737_v0 = vmax.f32 %v4030_v5, 0.0  ;;  %v2348_v8 = vadd.f32 %v2347_v6, %v2346_v63 }
 0x390   :  { %v2349_v38 = vpop.f32.mrf.mxu0 }
 0x391   :  { %v815_v9 = vrot.slane %v737_v0, 7  ;;  %v991_v3 = vadd.f32 %v2348_v8, %v911_v7 }
 0x392   :  { %v2350_v10 = vpop.f32.mrf.mxu0 }
 0x393   :  { %v2351_v37 = vadd.f32 %v2350_v10, %v2349_v38  ;;  %v816_v48 = vsel %vm447_vm1, %v813_v14, %v815_v9  ;;  %v1004_v17 = vmax.f32 %v991_v3, 0.0 }
 0x394   :  { %v2743_v30 = vpack.i.bf16 %v788_v36, %v816_v48 }
 0x395   :  { %v996_v16 = vadd.f32 %v2351_v37, %v916_v11 }
 0x396   :  { %2744 = vrot.lane.b32.xlu1 %v2743_v30, %s3012_s17 }
 0x397   :  { %v1005_v20 = vmax.f32 %v996_v16, 0.0 }
 0x399   :  { %v4043_v18 = vmax.f32 %v1004_v17, %v1005_v20 }
 0x39b   :  { %v2622_v21 = vpop.f32.mrf.mxu1 }
 0x39c   :  { %v1361_v22 = vadd.f32 %v2945_v24, %v2622_v21 }
 0x39d   :  { %v1355_v25 = vpop.f32.mrf.mxu1 }
 0x39e   :  { %v4048_v26 = vmax.f32 %v1361_v22, 0.0  ;;  %v1356_v14 = vadd.f32 %v2945_v24, %v1355_v25 }
 0x39f   :  { %v2625_v28 = vpop.f32.mrf.mxu1 }
 0x3a0   :  { %v4050_v29 = vmax.f32 %v1356_v14, 0.0  ;;  %v1371_v36 = vadd.f32 %v2945_v24, %v2625_v28  ;;  %v1414_v31 = vrot.slane %v4048_v26, 2  ;;  %v1482_v32 = vrot.slane %v4048_v26, 6 }
 0x3a1   :  { %v1365_v47 = vpop.f32.mrf.mxu1  ;;  %v1395_v12 = vrot.slane %v4048_v26, 1  ;;  %v1463_v33 = vrot.slane %v4048_v26, 5  ;;  %v1433_v34 = vrot.slane %v4048_v26, 3  ;;  %v1502_v53 = vrot.slane %v4048_v26, 7 }
 0x3a2   :  { %v4057_v35 = vmax.f32 %v1371_v36, 0.0  ;;  %v1366_v39 = vadd.f32 %v2945_v24, %v1365_v47  ;;  %v1413_v42 = vrot.slane %v4050_v29, 2  ;;  %v1481_v43 = vrot.slane %v4050_v29, 6 }
 0x3a3   :  { %v2628_v44 = vpop.f32.mrf.mxu1  ;;  %v1394_v45 = vrot.slane %v4050_v29, 1  ;;  %v1462_v15 = vrot.slane %v4050_v29, 5  ;;  %v1432_v27 = vrot.slane %v4050_v29, 3  ;;  %v1501_v46 = vrot.slane %v4050_v29, 7 }
 0x3a4   :  { %v4065_v49 = vmax.f32 %v1366_v39, 0.0  ;;  %v1415_v50 = vsel %vm354_vm4, %v1413_v42, %v1414_v31  ;;  %v1483_v51 = vsel %vm426_vm5, %v1481_v43, %v1482_v32  ;;  %v1399_v60 = vrot.slane %v4057_v35, 1 }
 0x3a5   :  { %v1375_v41 = vpop.f32.mrf.mxu1  ;;  %v2753_v54 = vpack.i.bf16 %v1415_v50, %v1483_v51  ;;  %v1396_v55 = vsel %vm334_vm2, %v1394_v45, %v1395_v12  ;;  %v1464_v56 = vsel %vm406_vm3, %v1462_v15, %v1463_v33  ;;  %v1434_v57 = vsel %vm374_vm0, %v1432_v27, %v1433_v34 }
 0x3a6   :  { %v2748_v58 = vpack.i.bf16 %v1396_v55, %v1464_v56  ;;  %v1503_v59 = vsel %vm447_vm1, %v1501_v46, %v1502_v53  ;;  %v1467_v61 = vrot.slane %v4057_v35, 5  ;;  %v1376_v1 = vadd.f32 %v2945_v24, %v1375_v41 }
 0x3a7   :  { %2754 = vrot.lane.b32.xlu1 %v2753_v54, %s3012_s17  ;;  %v2758_v2 = vpack.i.bf16 %v1434_v57, %v1503_v59  ;;  %v1418_v4 = vrot.slane %v4057_v35, 2  ;;  %v1397_v40 = vrot.slane %v4065_v49, 1  ;;  %v1486_v6 = vrot.slane %v4057_v35, 6 }
 0x3a8   :  { %2749 = vrot.lane.b32.xlu0 %v2748_v58, %s3011_s16  ;;  %v2763_v63 = vpack.i.bf16 %v1399_v60, %v1467_v61  ;;  %v1465_v7 = vrot.slane %v4065_v49, 5  ;;  %v1435_v8 = vrot.slane %v4065_v49, 3  ;;  %v1504_v38 = vrot.slane %v4065_v49, 7 }
 0x3a9   :  { %v1416_v9 = vrot.slane %v4065_v49, 2  ;;  %v1484_v3 = vrot.slane %v4065_v49, 6  ;;  %v1398_v10 = vsel %vm334_vm2, %v1395_v12, %v1397_v40  ;;  %v4090_v37 = vmax.f32 %v1376_v1, 0.0 }
 0x3aa   :  { %v1466_v11 = vsel %vm406_vm3, %v1463_v33, %v1465_v7  ;;  %v2768_v48 = vpack.i.bf16 %v1418_v4, %v1486_v6  ;;  %v1436_v30 = vsel %vm374_vm0, %v1433_v34, %v1435_v8  ;;  %v1505_v17 = vsel %vm447_vm1, %v1502_v53, %v1504_v38 }
 0x3ab   :  { %2759 = vrot.lane.b32.xlu1 %v2758_v2, %s3010_s13  ;;  %v2773_v16 = vpack.i.bf16 %v1398_v10, %v1466_v11  ;;  %v1417_v20 = vsel %vm354_vm4, %v1414_v31, %v1416_v9  ;;  %v1485_v21 = vsel %vm426_vm5, %v1482_v32, %v1484_v3  ;;  %v1381_v22 = vadd.f32 %v2945_v24, %v2628_v44 }
 0x3ac   :  { %2764 = vrot.lane.b32.xlu0 %v2763_v63, %s3011_s16  ;;  %v2783_v25 = vpack.i.bf16 %v1436_v30, %v1505_v17  ;;  %v2778_v14 = vpack.i.bf16 %v1417_v20, %v1485_v21  ;;  %v1419_v28 = vsel %vm354_vm4, %v1416_v9, %v1418_v4  ;;  %v1400_v36 = vsel %vm334_vm2, %v1397_v40, %v1399_v60 }
 0x3ad   :  { %v1487_v47 = vsel %vm426_vm5, %v1484_v3, %v1486_v6  ;;  %v1468_v12 = vsel %vm406_vm3, %v1465_v7, %v1467_v61  ;;  %v1522_v33 = vrot.slane %v4090_v37, 1  ;;  %v1550_v31 = vrot.slane %v4090_v37, 5 }
 0x3ae   :  { %v1437_v24 = vrot.slane %v4057_v35, 3  ;;  %v1506_v32 = vrot.slane %v4057_v35, 7  ;;  %v1389_v34 = vmax.f32 %v1381_v22, 0.0  ;;  %v2793_v39 = vpack.i.bf16 %v1419_v28, %v1487_v47 }
 0x3af   :  { %2769 = vrot.lane.b32.xlu1 %v2768_v48, %s3012_s17  ;;  %v2788_v42 = vpack.i.bf16 %v1400_v36, %v1468_v12  ;;  %v1523_v43 = vsel %vm334_vm2, %v1399_v60, %v1522_v33  ;;  %v1551_v44 = vsel %vm406_vm3, %v1467_v61, %v1550_v31  ;;  %v1508_v45 = vrot.slane %v4090_v37, 7 }
 0x3b0   :  { %2774 = vrot.lane.b32.xlu0 %v2773_v16, %s3011_s16  ;;  %v1538_v15 = vrot.slane %v4090_v37, 3  ;;  %v1438_v27 = vsel %vm374_vm0, %v1435_v8, %v1437_v24  ;;  %v1507_v46 = vsel %vm447_vm1, %v1504_v38, %v1506_v32  ;;  %v1530_v50 = vrot.slane %v4090_v37, 2 }
 0x3b1   :  { %v1558_v51 = vrot.slane %v4090_v37, 6  ;;  %v2803_v53 = vpack.i.bf16 %v1523_v43, %v1551_v44  ;;  %v1567_v41 = vrot.slane %v1389_v34, 7  ;;  %v2798_v54 = vpack.i.bf16 %v1438_v27, %v1507_v46 }
 0x3b2   :  { %v1509_v55 = vsel %vm447_vm1, %v1506_v32, %v1508_v45  ;;  %v1539_v56 = vsel %vm374_vm0, %v1437_v24, %v1538_v15  ;;  %v1531_v57 = vsel %vm354_vm4, %v1418_v4, %v1530_v50  ;;  %v2813_v2 = vpack.i.bf16 %v1522_v33, %v1550_v31  ;;  %v2946_v33 = vld [vmem:[%s4885_s5 + $0x78] sm:$0xff]  ;;  %v2947_v32 = vld [vmem:[%s4885_s5 + $0xf0] sm:$0xff] }
 0x3b3   :  { %2784 = vrot.lane.b32.xlu1 %v2783_v25, %s3010_s13  ;;  %v1559_v58 = vsel %vm426_vm5, %v1486_v6, %v1558_v51  ;;  %v2823_v59 = vpack.i.bf16 %v1539_v56, %v1509_v55  ;;  %v1568_v61 = vsel %vm447_vm1, %v1508_v45, %v1567_v41  ;;  %v2818_v40 = vpack.i.bf16 %v1530_v50, %v1558_v51  ;;  %v2949_v45 = vld [vmem:[%s4885_s5 + $0xe8] sm:$0xff] }
 0x3b4   :  { %2779 = vrot.lane.b32.xlu0 %v2778_v14, %s3012_s17  ;;  %v2808_v60 = vpack.i.bf16 %v1531_v57, %v1559_v58  ;;  %v2828_v1 = vpack.i.bf16 %v1568_v61, %v1437_v24  ;;  %v805_v4 = vrot.slane %v737_v0, 6  ;;  %v1451_v3 = vrot.slane %v4050_v29, 4  ;;  %v2950_v50 = vld [vmem:[%s4885_s5 + $0x68] sm:$0xff]  ;;  %v2952_v58 = vld [vmem:[%s4885_s5 + $0x60] sm:$0xff]  ;;  %v2953_v61 = vld [vmem:[%s4885_s5 + $0xd8] sm:$0xff] }
 0x3b5   :  { %v1452_v0 = vrot.slane %v4048_v26, 4  ;;  %v4175_v41 = vrot.slane %v4057_v35, 4 }
 0x3b6   :  { %v806_v8 = vsel %vm426_vm5, %v803_v13, %v805_v4 }
 0x3b7   :  { %2794 = vrot.lane.b32.xlu1 %v2793_v39, %s3012_s17  ;;  %v1453_v13 = vsel %vm394_vm6, %v1451_v3, %v1452_v0  ;;  %v2948_v39 = vld [vmem:[%s4885_s5 + $0x70] sm:$0xff]  ;;  %v2955_v3 = vld [vmem:[%s4885_s5 + $0x58] sm:$0xff] }
 0x3b8   :  { %2789 = vrot.lane.b32.xlu0 %v2788_v42, %s3011_s16 }
 0x3bb   :  { %2804 = vrot.lane.b32.xlu1 %v2803_v53, %s3011_s16 }
 0x3bc   :  { %2799 = vrot.lane.b32.xlu0 %v2798_v54, %s3010_s13  ;;  %v2951_v54 = vld [vmem:[%s4885_s5 + $0xe0] sm:$0xff] }
 0x3bf   :  { %2824 = vrot.lane.b32.xlu1 %v2823_v59, %s3010_s13 }
 0x3c0   :  { %2809 = vrot.lane.b32.xlu0 %v2808_v60, %s3012_s17 }
 0x3c3   :  { %2829 = vrot.lane.b32.xlu1 %v2828_v1, %s3010_s13 }
 0x3c4   :  { %2814 = vrot.lane.b32.xlu0 %v2813_v2, %s3011_s16 }
 0x3c7   :  { %1542 = vrot.lane.b32.xlu1 %v1538_v15, %s3010_s13 }
 0x3c8   :  { %2819 = vrot.lane.b32.xlu0 %v2818_v40, %s3012_s17 }
 0x408   :  { %v2745_v63 = vpop.permute.xlu1 %2744 }
 0x409   :  { %v2747_v6 = vunpack.i.h.bf16 %v2745_v63  ;;  %v2746_v7 = vunpack.i.l.bf16 %v2745_v63 }
 0x40b   :  { %v837_v38 = vsel %vm524_vm8, %v806_v8, %v2746_v7  ;;  %v834_v9 = vsel %vm524_vm8, %v780_v19, %v2747_v6 }
 0x40c   :  { %998 = vmatprep.mubr.f32.mxu0 %v837_v38  ;;  %v1546_v38 = vrot.slane %v4090_v37, 4 }
 0x40d   :  { %999 = vmatmul.mubr.f32.gmra.mxu0 %v834_v9  ;;  %v2954_v9 = vld [vmem:[%s4885_s5 + $0x178] sm:$0xff] }
 0x419   :  { %v2755_v10 = vpop.permute.xlu1 %2754 }
 0x41a   :  { %v2750_v5 = vpop.permute.xlu0 %2749  ;;  %v2757_v11 = vunpack.i.h.bf16 %v2755_v10  ;;  %v2756_v48 = vunpack.i.l.bf16 %v2755_v10 }
 0x41b   :  { %v2752_v30 = vunpack.i.h.bf16 %v2750_v5  ;;  %v2751_v16 = vunpack.i.l.bf16 %v2750_v5 }
 0x41d   :  { %v1572_v17 = vsel %vm519_vm7, %v4050_v29, %v2752_v30  ;;  %v2760_v52 = vpop.permute.xlu1 %2759  ;;  %v1584_v19 = vsel %vm519_vm7, %v1453_v13, %v2751_v16  ;;  %v1454_v29 = vrot.slane %v4065_v49, 4  ;;  %v2958_v16 = vld [vmem:[%s4885_s5 + $0x170] sm:$0xff] }
 0x41e   :  { %v2762_v20 = vunpack.i.h.bf16 %v2760_v52  ;;  %v2761_v21 = vunpack.i.l.bf16 %v2760_v52  ;;  %v4146_v22 = vpop.permute.xlu0 %2764  ;;  %v1588_v25 = vsel %vm524_vm8, %v1584_v19, %v2756_v48  ;;  %v1576_v14 = vsel %vm524_vm8, %v1572_v17, %v2757_v11  ;;  %v2959_v13 = vld [vmem:[%s4885_s5 + $0x50] sm:$0xff] }
 0x41f   :  { %v1455_v46 = vsel %vm394_vm6, %v1452_v0, %v1454_v29  ;;  %v1457_v63 = vsel %vm394_vm6, %v1454_v29, %v4175_v41  ;;  %v2766_v10 = vunpack.i.l.bf16 %v4146_v22  ;;  %v2956_v0 = vld [vmem:[%s4885_s5 + $0x1f0] sm:$0xff]  ;;  %v2962_v29 = vld [vmem:[%s4885_s5 + $0x168] sm:$0xff] }
 0x420   :  { %v1592_v28 = vsel %vm529_vm9, %v1588_v25, %v2761_v21  ;;  %v1580_v36 = vsel %vm529_vm9, %v1576_v14, %v2762_v20  ;;  %v2960_v21 = vld [vmem:[%s4885_s5 + $0x1e8] sm:$0xff] }
 0x421   :  { %v4152_v47 = vpop.permute.xlu1 %2769  ;;  %1672 = vmatprep.mubr.f32.mxu0 %v1592_v28  ;;  %v2961_v25 = vld [vmem:[%s4885_s5 + $0xc8] sm:$0xff] }
 0x422   :  { %v2775_v12 = vpop.permute.xlu0 %2774  ;;  %1673 = vmatmul.mubr.f32.vlgmr.msra.gmra.mxu0 %v1580_v36  ;;  %v2771_v11 = vunpack.i.l.bf16 %v4152_v47 }
 0x423   :  { %2466 = vmatpush3.msra.mxu0 %v2946_v33  ;;  %v2777_v31 = vunpack.i.h.bf16 %v2775_v12  ;;  %v2776_v24 = vunpack.i.l.bf16 %v2775_v12  ;;  %v1547_v12 = vsel %vm394_vm6, %v4175_v41, %v1546_v38  ;;  %v2963_v33 = vld [vmem:[%s4885_s5 + $0x48] sm:$0xff] }
 0x424   :  { %2467 = vmatprep.subr.mxu0 %v2947_v32 }
 0x425   :  { %v2785_v34 = vpop.permute.xlu1 %2784  ;;  %2468 = vmatpush3.msra.mxu0 %v2948_v39  ;;  %v1585_v51 = vsel %vm519_vm7, %v1455_v46, %v2776_v24  ;;  %v1573_v53 = vsel %vm519_vm7, %v4048_v26, %v2777_v31  ;;  %v2767_v31 = vunpack.i.h.bf16 %v4146_v22  ;;  %v1587_v39 = vsel %vm519_vm7, %v4175_v41, %v2766_v10  ;;  %v2964_v46 = vld [vmem:[%s4885_s5 + $0x1e0] sm:$0xff]  ;;  %v2975_v10 = vld [vmem:[%s4885_s5 + $0x38] sm:$0xff] }
 0x426   :  { %v2787_v42 = vunpack.i.h.bf16 %v2785_v34  ;;  %v2786_v43 = vunpack.i.l.bf16 %v2785_v34  ;;  %v2780_v44 = vpop.permute.xlu0 %2779  ;;  %2469 = vmatprep.subr.mxu0 %v2949_v45  ;;  %v1591_v45 = vsel %vm524_vm8, %v1587_v39, %v2771_v11  ;;  %v2966_v41 = vld [vmem:[%s4885_s5 + $0x160] sm:$0xff]  ;;  %v2994_v39 = vld [vmem:[%s4885_s5 + $0x198] sm:$0xff] }
 0x427   :  { %v2782_v15 = vunpack.i.h.bf16 %v2780_v44  ;;  %v2781_v27 = vunpack.i.l.bf16 %v2780_v44  ;;  %2470 = vmatpush3.msra.mxu0 %v2950_v50  ;;  %v2976_v11 = vld [vmem:[%s4885_s5 + $0x1c0] sm:$0xff] }
 0x428   :  { %2471 = vmatprep.subr.mxu0 %v2951_v54 }
 0x429   :  { %v2795_v55 = vpop.permute.xlu1 %2794  ;;  %v1589_v56 = vsel %vm524_vm8, %v1585_v51, %v2781_v27  ;;  %v1577_v57 = vsel %vm524_vm8, %v1573_v53, %v2782_v15  ;;  %2472 = vmatpush3.msra.mxu0 %v2952_v58  ;;  %v1575_v58 = vsel %vm519_vm7, %v4057_v35, %v2767_v31  ;;  %v2990_v31 = vld [vmem:[%s4885_s5 + $0x1a0] sm:$0xff] }
 0x42a   :  { %v2790_v59 = vpop.permute.xlu0 %2789  ;;  %v1593_v26 = vsel %vm529_vm9, %v1589_v56, %v2786_v43  ;;  %v1581_v60 = vsel %vm529_vm9, %v1577_v57, %v2787_v42  ;;  %2473 = vmatprep.subr.mxu0 %v2953_v61  ;;  %v2797_v40 = vunpack.i.h.bf16 %v2795_v55  ;;  %v2796_v4 = vunpack.i.l.bf16 %v2795_v55  ;;  %v2969_v61 = vld [vmem:[%s4885_s5 + $0x158] sm:$0xff] }
 0x42b   :  { %v2792_v1 = vunpack.i.h.bf16 %v2790_v59  ;;  %v2791_v2 = vunpack.i.l.bf16 %v2790_v59  ;;  %1677 = vmatprep.mubr.f32.mxu0 %v1593_v26  ;;  %1757 = vmatprep.mubr.f32.mxu1 %v1593_v26  ;;  %v2772_v42 = vunpack.i.h.bf16 %v4152_v47  ;;  %v2965_v47 = vld [vmem:[%s4885_s5 + $0xc0] sm:$0xff]  ;;  %v2967_v59 = vld [vmem:[%s4885_s5 + $0x1d8] sm:$0xff] }
 0x42c   :  { %1678 = vmatmul.mubr.f32.gmra.mxu0 %v1581_v60  ;;  %1758 = vmatmul.mubr.f32.vlgmr.msra.gmra.mxu1 %v1581_v60  ;;  %v2968_v26 = vld [vmem:[%s4885_s5 + $0x40] sm:$0xff] }
 0x42d   :  { %v2805_v6 = vpop.permute.xlu1 %2804  ;;  %v1586_v7 = vsel %vm519_vm7, %v1457_v63, %v2791_v2  ;;  %v1574_v8 = vsel %vm519_vm7, %v4065_v49, %v2792_v1  ;;  %2507 = vmatpush3.msra.mxu1 %v2954_v9  ;;  %2474 = vmatpush3.msra.mxu0 %v2955_v3  ;;  %v2957_v49 = vld [vmem:[%s4885_s5 + $0xd0] sm:$0xff]  ;;  %v1579_v60 = vsel %vm524_vm8, %v1575_v58, %v2772_v42  ;;  %v2974_v3 = vld [vmem:[%s4885_s5 + $0x148] sm:$0xff] }
 0x42e   :  { %v2800_v5 = vpop.permute.xlu0 %2799  ;;  %2508 = vmatprep.subr.mxu1 %v2956_v0  ;;  %2475 = vmatprep.subr.mxu0 %v2957_v49  ;;  %v2807_v17 = vunpack.i.h.bf16 %v2805_v6  ;;  %v2806_v52 = vunpack.i.l.bf16 %v2805_v6  ;;  %v1590_v19 = vsel %vm524_vm8, %v1586_v7, %v2796_v4  ;;  %v1578_v20 = vsel %vm524_vm8, %v1574_v8, %v2797_v40  ;;  %v2970_v40 = vld [vmem:[%s4885_s5 + $0x1d0] sm:$0xff]  ;;  %v2972_v6 = vld [vmem:[%s4885_s5 + $0x1c8] sm:$0xff]  ;;  %v2973_v7 = vld [vmem:[%s4885_s5 + $0xb8] sm:$0xff] }
 0x42f   :  { %v2802_v48 = vunpack.i.h.bf16 %v2800_v5  ;;  %v2801_v30 = vunpack.i.l.bf16 %v2800_v5  ;;  %2509 = vmatpush3.msra.mxu1 %v2958_v16  ;;  %2476 = vmatpush3.msra.mxu0 %v2959_v13  ;;  %v2971_v4 = vld [vmem:[%s4885_s5 + $0x150] sm:$0xff] }
 0x430   :  { %2510 = vmatprep.subr.mxu1 %v2960_v21  ;;  %2477 = vmatprep.subr.mxu0 %v2961_v25  ;;  %v1602_v22 = vsel %vm519_vm7, %v1547_v12, %v2806_v52  ;;  %v1596_v27 = vsel %vm519_vm7, %v4057_v35, %v2807_v17  ;;  %v2982_v21 = vld [vmem:[%s4885_s5 + $0x138] sm:$0xff]  ;;  %v2983_v25 = vld [vmem:[%s4885_s5 + $0x1b0] sm:$0xff]  ;;  %v2987_v12 = vld [vmem:[%s4885_s5 + $0xa0] sm:$0xff] }
 0x431   :  { %v2825_v14 = vpop.permute.xlu1 %2824  ;;  %v1594_v28 = vsel %vm529_vm9, %v1590_v19, %v2801_v30  ;;  %v1582_v36 = vsel %vm529_vm9, %v1578_v20, %v2802_v48  ;;  %2511 = vmatpush3.msra.mxu1 %v2962_v29  ;;  %2478 = vmatpush3.msra.mxu0 %v2963_v33  ;;  %v2977_v48 = vld [vmem:[%s4885_s5 + $0xb0] sm:$0xff]  ;;  %v2980_v19 = vld [vmem:[%s4885_s5 + $0x1b8] sm:$0xff]  ;;  %v2981_v20 = vld [vmem:[%s4885_s5 + $0xa8] sm:$0xff] }
 0x432   :  { %v2827_v24 = vunpack.i.h.bf16 %v2825_v14  ;;  %v2826_v32 = vunpack.i.l.bf16 %v2825_v14  ;;  %v2810_v34 = vpop.permute.xlu0 %2809  ;;  %1682 = vmatprep.mubr.f32.mxu0 %v1594_v28  ;;  %1762 = vmatprep.mubr.f32.mxu1 %v1594_v28  ;;  %v2984_v14 = vld [vmem:[%s4885_s5 + $0x130] sm:$0xff]  ;;  %v2985_v28 = vld [vmem:[%s4885_s5 + $0x28] sm:$0xff]  ;;  %v2989_v33 = vld [vmem:[%s4885_s5 + $0x20] sm:$0xff] }
 0x433   :  { %v2812_v43 = vunpack.i.h.bf16 %v2810_v34  ;;  %v2811_v44 = vunpack.i.l.bf16 %v2810_v34  ;;  %1683 = vmatmul.mubr.f32.gmra.mxu0 %v1582_v36  ;;  %1763 = vmatmul.mubr.f32.gmra.mxu1 %v1582_v36  ;;  %v2986_v36 = vld [vmem:[%s4885_s5 + $0x1a8] sm:$0xff]  ;;  %v2993_v34 = vld [vmem:[%s4885_s5 + $0x18] sm:$0xff]  ;;  %v2995_v42 = vld [vmem:[%s4885_s5 + $0x90] sm:$0xff] }
 0x434   :  { %v1595_v15 = vsel %vm529_vm9, %v1591_v45, %v2826_v32  ;;  %2512 = vmatprep.subr.mxu1 %v2964_v46  ;;  %2479 = vmatprep.subr.mxu0 %v2965_v47  ;;  %v2988_v29 = vld [vmem:[%s4885_s5 + $0x128] sm:$0xff]  ;;  %v2998_v45 = vld [vmem:[%s4885_s5 + $0x190] sm:$0xff]  ;;  %v3003_v47 = vld [vmem:[%s4885_s5 + $0x80] sm:$0xff] }
 0x435   :  { %v2830_v50 = vpop.permute.xlu1 %2829  ;;  %1687 = vmatprep.mubr.f32.mxu0 %v1595_v15  ;;  %v1604_v51 = vsel %vm524_vm8, %v1602_v22, %v2811_v44  ;;  %v1598_v53 = vsel %vm524_vm8, %v1596_v27, %v2812_v43  ;;  %2513 = vmatpush3.msra.mxu1 %v2966_v41  ;;  %v2996_v43 = vld [vmem:[%s4885_s5 + $0x118] sm:$0xff]  ;;  %v2997_v44 = vld [vmem:[%s4885_s5 + $0x10] sm:$0xff]  ;;  %v2999_v15 = vld [vmem:[%s4885_s5 + $0x88] sm:$0xff] }
 0x436   :  { %v2831_v54 = vunpack.i.l.bf16 %v2830_v50  ;;  %v2815_v55 = vpop.permute.xlu0 %2814  ;;  %v1606_v56 = vsel %vm529_vm9, %v1604_v51, %v2826_v32  ;;  %v1600_v57 = vsel %vm529_vm9, %v1598_v53, %v2827_v24  ;;  %2514 = vmatprep.subr.mxu1 %v2967_v59  ;;  %2480 = vmatpush3.msra.mxu0 %v2968_v26  ;;  %v2832_v5 = vunpack.i.h.bf16 %v2830_v50  ;;  %v2991_v24 = vld [vmem:[%s4885_s5 + $0x98] sm:$0xff]  ;;  %v2992_v32 = vld [vmem:[%s4885_s5 + $0x120] sm:$0xff]  ;;  %v3000_v22 = vld [vmem:[%s4885_s5 + $0x110] sm:$0xff] }
 0x437   :  { %1767 = vmatprep.mubr.f32.mxu1 %v1606_v56  ;;  %2515 = vmatpush3.msra.mxu1 %v2969_v61  ;;  %v2817_v1 = vunpack.i.h.bf16 %v2815_v55  ;;  %v2816_v35 = vunpack.i.l.bf16 %v2815_v55  ;;  %v3001_v27 = vld [vmem:[%s4885_s5 + $0x8] sm:$0xff]  ;;  %v3005_v51 = vld [vmem:[%s4885_s5] sm:$0xff] }
 0x438   :  { %1768 = vmatmul.mubr.f32.gmra.mxu1 %v1600_v57  ;;  %v1583_v2 = vsel %vm529_vm9, %v1579_v60, %v2831_v54  ;;  %2516 = vmatprep.subr.mxu1 %v2970_v40  ;;  %v3002_v46 = vld [vmem:[%s4885_s5 + $0x188] sm:$0xff]  ;;  %v3006_v53 = vld [vmem:[%s4885_s5 + $0x180] sm:$0xff]  ;;  %v3013_v54 = vmov 0   ;;  %v921_v57 = vadd.f32 %v4022_v62, %v4028_v23 }
 0x439   :  { %1688 = vmatmul.mubr.f32.gmra.mxu0 %v1583_v2  ;;  %2517 = vmatpush3.msra.mxu1 %v2971_v4  ;;  %v1603_v0 = vsel %vm519_vm7, %v1546_v38, %v2816_v35  ;;  %v1597_v49 = vsel %vm519_vm7, %v4090_v37, %v2817_v1  ;;  %v1543_v30 = vpop.permute.xlu1 %1542  ;;  %v2978_v38 = vld [vmem:[%s4885_s5 + $0x140] sm:$0xff]  ;;  %v2979_v37 = vld [vmem:[%s4885_s5 + $0x30] sm:$0xff]  ;;  %v3004_v50 = vld [vmem:[%s4885_s5 + $0x108] sm:$0xff] }
 0x43a   :  { %v2820_v63 = vpop.permute.xlu0 %2819  ;;  %2518 = vmatprep.subr.mxu1 %v2972_v6  ;;  %2481 = vmatprep.subr.mxu0 %v2973_v7  ;;  %v3007_v41 = vld [vmem:[%s4885_s5 + $0x100] sm:$0xff] }
 0x43b   :  { %v2822_v8 = vunpack.i.h.bf16 %v2820_v63  ;;  %v2821_v9 = vunpack.i.l.bf16 %v2820_v63  ;;  %2519 = vmatpush3.msra.mxu1 %v2974_v3  ;;  %2482 = vmatpush3.msra.mxu0 %v2975_v10  ;;  %v3008_v62 = vld [vmem:[%s4886_s4] ss:$0 sm:$0xff] }
 0x43c   :  { %2520 = vmatprep.subr.mxu1 %v2976_v11  ;;  %2483 = vmatprep.subr.mxu0 %v2977_v48 }
 0x43d   :  { %v1605_v16 = vsel %vm524_vm8, %v1603_v0, %v2821_v9  ;;  %v1599_v13 = vsel %vm524_vm8, %v1597_v49, %v2822_v8  ;;  %2521 = vmatpush3.msra.mxu1 %v2978_v38  ;;  %2484 = vmatpush3.msra.mxu0 %v2979_v37 }
 0x43e   :  { %v1607_v17 = vsel %vm529_vm9, %v1605_v16, %v2832_v5  ;;  %v1601_v52 = vsel %vm529_vm9, %v1599_v13, %v1543_v30  ;;  %2522 = vmatprep.subr.mxu1 %v2980_v19  ;;  %2485 = vmatprep.subr.mxu0 %v2981_v20 }
 0x43f   :  { %1772 = vmatprep.mubr.f32.mxu1 %v1607_v17  ;;  %2523 = vmatpush3.msra.mxu1 %v2982_v21 }
 0x440   :  { %1773 = vmatmul.mubr.f32.gmra.mxu1 %v1601_v52  ;;  %2524 = vmatprep.subr.mxu1 %v2983_v25 }
 0x441   :  { %2525 = vmatpush3.msra.mxu1 %v2984_v14  ;;  %2486 = vmatpush3.msra.mxu0 %v2985_v28 }
 0x442   :  { %2526 = vmatprep.subr.mxu1 %v2986_v36  ;;  %2487 = vmatprep.subr.mxu0 %v2987_v12 }
 0x443   :  { %2527 = vmatpush3.msra.mxu1 %v2988_v29  ;;  %2488 = vmatpush3.msra.mxu0 %v2989_v33 }
 0x444   :  { %2528 = vmatprep.subr.mxu1 %v2990_v31  ;;  %2489 = vmatprep.subr.mxu0 %v2991_v24 }
 0x445   :  { %2529 = vmatpush3.msra.mxu1 %v2992_v32  ;;  %2490 = vmatpush3.msra.mxu0 %v2993_v34 }
 0x446   :  { %2530 = vmatprep.subr.mxu1 %v2994_v39  ;;  %2491 = vmatprep.subr.mxu0 %v2995_v42 }
 0x447   :  { %2531 = vmatpush3.msra.mxu1 %v2996_v43  ;;  %2492 = vmatpush3.msra.mxu0 %v2997_v44 }
 0x448   :  { %2532 = vmatprep.subr.mxu1 %v2998_v45  ;;  %2493 = vmatprep.subr.mxu0 %v2999_v15 }
 0x449   :  { %2533 = vmatpush3.msra.mxu1 %v3000_v22  ;;  %2494 = vmatpush3.msra.mxu0 %v3001_v27 }
 0x44a   :  { %2534 = vmatprep.subr.mxu1 %v3002_v46  ;;  %2495 = vmatprep.subr.mxu0 %v3003_v47 }
 0x44b   :  { %2535 = vmatpush3.msra.mxu1 %v3004_v50  ;;  %2496 = vmatpush3.msra.mxu0 %v3005_v51 }
 0x44c   :  { %2536 = vmatprep.subr.mxu1 %v3006_v53  ;;  %2863 = vset.pattern.permute.xlu0 %v3013_v54 }
 0x44d   :  { %2537 = vmatpush3.msra.mxu1 %v3007_v41  ;;  %2864 = vset.pattern.permute.xlu1 %v3013_v54 }
 0x4cd   :  { %v2352_v55 = vpop.f32.mrf.mxu0 }
 0x4cf   :  { %v2353_v56 = vpop.f32.mrf.mxu0 }
 0x4d0   :  { %v2354_v58 = vadd.f32 %v2353_v56, %v2352_v55 }
 0x4d2   :  { %v1001_v59 = vadd.f32 %v2354_v58, %v921_v57 }
 0x4d4   :  { %v1006_v26 = vmax.f32 %v1001_v59, 0.0 }
 0x4d6   :  { %v1007_v60 = vsel %vm406_vm3, %v1006_v26, -inf }
 0x4d7   :  { %v4398_v61 = vmax.f32 %v4043_v18, %v1007_v60 }
 0x4e2   :  { %v2409_v1 = vpop.f32.mrf.mxu0 }
 0x4e4   :  { %v2410_v35 = vpop.f32.mrf.mxu0 }
 0x4e5   :  { %v2411_v4 = vadd.f32 %v2410_v35, %v2409_v1 }
 0x4e7   :  { %v1675_v23 = vadd.f32 %v3008_v62, %v2411_v4  ;;  %v182_v4 = vld [vmem:[%s4888_s7 + $0x18] sm:$0xff] }
 0x4ec   :  { %v2412_v2 = vpop.f32.mrf.mxu0  ;;  %v2453_v40 = vpop.f32.mrf.mxu1 }
 0x4ee   :  { %v2454_v63 = vpop.f32.mrf.mxu1  ;;  %v2413_v6 = vpop.f32.mrf.mxu0 }
 0x4ef   :  { %v2455_v7 = vadd.f32 %v2454_v63, %v2453_v40  ;;  %v2414_v8 = vadd.f32 %v2413_v6, %v2412_v2  ;;  %v179_v2 = vld [vmem:[%s4888_s7] sm:$0xff]  ;;  %v180_v40 = vld [vmem:[%s4888_s7 + $0x8] sm:$0xff]  ;;  %v181_v63 = vld [vmem:[%s4888_s7 + $0x10] sm:$0xff] }
 0x4f0   :  { %v184_v6 = vld [vmem:[%s4888_s7 + $0x28] sm:$0xff] }
 0x4f1   :  { %v1760_v9 = vadd.f32 %v2455_v7, %v1675_v23  ;;  %v1680_v0 = vadd.f32 %v3008_v62, %v2414_v8  ;;  %v183_v7 = vld [vmem:[%s4888_s7 + $0x20] sm:$0xff]  ;;  %v185_v23 = vld [vmem:[%s4888_s7 + $0x30] sm:$0xff]  ;;  %v188_v8 = vld [vmem:[%s4888_s7 + $0x48] sm:$0xff] }
 0x4f3   :  { %v2415_v3 = vpop.f32.mrf.mxu0  ;;  %v2456_v10 = vpop.f32.mrf.mxu1  ;;  %v4403_v11 = vmax.f32 %v1760_v9, 0.0  ;;  %v187_v9 = vld [vmem:[%s4888_s7 + $0x40] sm:$0xff] }
 0x4f5   :  { %v2416_v5 = vpop.f32.mrf.mxu0  ;;  %v2457_v18 = vpop.f32.mrf.mxu1  ;;  %v1829_v20 = vrot.slane %v4403_v11, 5  ;;  %v1854_v21 = vrot.slane %v4403_v11, 7  ;;  %v1785_v28 = vrot.slane %v4403_v11, 1  ;;  %v1807_v29 = vrot.slane %v4403_v11, 3 }
 0x4f6   :  { %v2458_v49 = vadd.f32 %v2457_v18, %v2456_v10  ;;  %v2417_v48 = vadd.f32 %v2416_v5, %v2415_v3  ;;  %v190_v3 = vld [vmem:[%s4888_s7 + $0x58] sm:$0xff]  ;;  %v189_v10 = vld [vmem:[%s4888_s7 + $0x50] sm:$0xff]  ;;  %v192_v5 = vld [vmem:[%s4888_s7 + $0x68] sm:$0xff] }
 0x4f7   :  { %v191_v18 = vld [vmem:[%s4888_s7 + $0x60] sm:$0xff] }
 0x4f8   :  { %v1765_v30 = vadd.f32 %v2458_v49, %v1680_v0  ;;  %v2459_v16 = vpop.f32.mrf.mxu1  ;;  %v1685_v17 = vadd.f32 %v3008_v62, %v2417_v48  ;;  %v194_v0 = vld [vmem:[%s4888_s7 + $0x78] sm:$0xff]  ;;  %v193_v49 = vld [vmem:[%s4888_s7 + $0x70] sm:$0xff]  ;;  %v196_v48 = vld [vmem:[%s4888_s7 + $0x88] sm:$0xff] }
 0x4f9   :  { %v2418_v13 = vpop.f32.mrf.mxu0 }
 0x4fa   :  { %v4405_v38 = vmax.f32 %v1765_v30, 0.0  ;;  %v2460_v37 = vpop.f32.mrf.mxu1  ;;  %v195_v30 = vld [vmem:[%s4888_s7 + $0x80] sm:$0xff] }
 0x4fb   :  { %v2461_v52 = vadd.f32 %v2460_v37, %v2459_v16  ;;  %v2419_v19 = vpop.f32.mrf.mxu0  ;;  %v198_v16 = vld [vmem:[%s4889_s8] sm:$0xff]  ;;  %v200_v37 = vld [vmem:[%s4889_s8 + $0x10] sm:$0xff] }
 0x4fc   :  { %v1830_v25 = vrot.slane %v4405_v38, 5  ;;  %v1855_v14 = vrot.slane %v4405_v38, 7  ;;  %v1786_v36 = vrot.slane %v4405_v38, 1  ;;  %v1808_v33 = vrot.slane %v4405_v38, 3 }
 0x4fd   :  { %v1770_v12 = vadd.f32 %v2461_v52, %v1685_v17  ;;  %v2420_v31 = vadd.f32 %v2419_v19, %v2418_v13  ;;  %v197_v13 = vld [vmem:[%s4888_s7 + $0x90] sm:$0x3f]  ;;  %v199_v17 = vld [vmem:[%s4889_s8 + $0x8] sm:$0xff]  ;;  %v202_v52 = vld [vmem:[%s4889_s8 + $0x20] sm:$0xff] }
 0x4fe   :  { %v1831_v24 = vsel %vm406_vm3, %v1829_v20, %v1830_v25  ;;  %v1856_v32 = vsel %vm447_vm1, %v1854_v21, %v1855_v14  ;;  %v1787_v34 = vsel %vm334_vm2, %v1785_v28, %v1786_v36  ;;  %v1809_v43 = vsel %vm374_vm0, %v1807_v29, %v1808_v33  ;;  %v201_v19 = vld [vmem:[%s4889_s8 + $0x18] sm:$0xff]  ;;  %v204_v20 = vld [vmem:[%s4889_s8 + $0x30] sm:$0xff]  ;;  %v203_v21 = vld [vmem:[%s4889_s8 + $0x28] sm:$0xff] }
 0x4ff   :  { %v4418_v39 = vmax.f32 %v1770_v12, 0.0  ;;  %v2838_v42 = vpack.i.bf16 %v1831_v24, %v1856_v32  ;;  %v2833_v45 = vpack.i.bf16 %v1787_v34, %v1809_v43  ;;  %v1690_v47 = vadd.f32 %v3008_v62, %v2420_v31  ;;  %v186_v62 = vld [vmem:[%s4888_s7 + $0x38] sm:$0xff]  ;;  %v208_v28 = vld [vmem:[%s4889_s8 + $0x50] sm:$0xff]  ;;  %v210_v12 = vld [vmem:[%s4889_s8 + $0x60] sm:$0xff] }
 0x500   :  { %v2462_v44 = vpop.f32.mrf.mxu1  ;;  %v209_v29 = vld [vmem:[%s4889_s8 + $0x58] sm:$0xff]  ;;  %v211_v31 = vld [vmem:[%s4889_s8 + $0x68] sm:$0xff]  ;;  %v214_v24 = vld [vmem:[%s4889_s8 + $0x80] sm:$0xff]  ;;  %v1800_v43 = vrot.slane %v4405_v38, 2 }
 0x501   :  { %2839 = vrot.lane.b32.xlu1 %v2838_v42, %s3012_s17  ;;  %v1832_v15 = vrot.slane %v4418_v39, 5  ;;  %v1857_v22 = vrot.slane %v4418_v39, 7  ;;  %v1788_v27 = vrot.slane %v4418_v39, 1  ;;  %v1810_v46 = vrot.slane %v4418_v39, 3  ;;  %2834 = vrot.lane.b32.xlu0 %v2833_v45, %s3012_s17  ;;  %v213_v32 = vld [vmem:[%s4889_s8 + $0x78] sm:$0xff]  ;;  %v215_v42 = vld [vmem:[%s4889_s8 + $0x88] sm:$0xff] }
 0x502   :  { %v2463_v50 = vpop.f32.mrf.mxu1  ;;  %v216_v34 = vld [vmem:[%s4889_s8 + $0x90] sm:$0x3f]  ;;  %v1822_v45 = vrot.slane %v4405_v38, 4 }
 0x503   :  { %v2464_v51 = vadd.f32 %v2463_v50, %v2462_v44  ;;  %v1833_v53 = vsel %vm406_vm3, %v1830_v25, %v1832_v15  ;;  %v1858_v41 = vsel %vm447_vm1, %v1855_v14, %v1857_v22  ;;  %v1789_v54 = vsel %vm334_vm2, %v1786_v36, %v1788_v27  ;;  %v206_v25 = vld [vmem:[%s4889_s8 + $0x40] sm:$0xff]  ;;  %v205_v14 = vld [vmem:[%s4889_s8 + $0x38] sm:$0xff]  ;;  %v207_v36 = vld [vmem:[%s4889_s8 + $0x48] sm:$0xff] }
 0x504   :  { %v2853_v55 = vpack.i.bf16 %v1833_v53, %v1858_v41  ;;  %v1811_v56 = vsel %vm374_vm0, %v1808_v33, %v1810_v46  ;;  %v2848_v60 = vpack.i.bf16 %v1788_v27, %v1810_v46  ;;  %v212_v33 = vld [vmem:[%s4889_s8 + $0x70] sm:$0xff]  ;;  %v1845_v44 = vrot.slane %v4405_v38, 6 }
 0x505   :  { %v4431_v57 = vadd.f32 %v2464_v51, %v1690_v47  ;;  %v2843_v58 = vpack.i.bf16 %v1789_v54, %v1811_v56  ;;  %v1844_v27 = vrot.slane %v4403_v11, 6  ;;  %v1821_v46 = vrot.slane %v4403_v11, 4 }
 0x506   :  { %2854 = vrot.lane.b32.xlu1 %v2853_v55, %s3012_s17 }
 0x507   :  { %v1781_v59 = vmax.f32 %v4431_v57, 0.0  ;;  %2844 = vrot.lane.b32.xlu0 %v2843_v58, %s3012_s17  ;;  %v1846_v55 = vsel %vm426_vm5, %v1844_v27, %v1845_v44  ;;  %v1823_v56 = vsel %vm394_vm6, %v1821_v46, %v1822_v45 }
 0x509   :  { %v1859_v26 = vrot.slane %v1781_v59, 7 }
 0x50b   :  { %2849 = vrot.lane.b32.xlu0 %v2848_v60, %s3012_s17  ;;  %v1860_v1 = vsel %vm447_vm1, %v1857_v22, %v1859_v26  ;;  %v1847_v60 = vrot.slane %v4418_v39, 6 }
 0x50c   :  { %v2858_v35 = vpack.i.bf16 %v1832_v15, %v1860_v1  ;;  %v1799_v15 = vrot.slane %v4403_v11, 2  ;;  %v1824_v1 = vrot.slane %v4418_v39, 4 }
 0x50e   :  { %2859 = vrot.lane.b32.xlu1 %v2858_v35, %s3012_s17  ;;  %v1801_v53 = vsel %vm354_vm4, %v1799_v15, %v1800_v43 }
 0x50f   :  { %1018 = vperm.xlu0 %2863, %v179_v2  }
 0x512   :  { %1023 = vperm.xlu1 %2864, %v180_v40   ;;  %v1802_v40 = vrot.slane %v4418_v39, 2 }
 0x513   :  { %1033 = vperm.xlu0 %2863, %v182_v4  }
 0x516   :  { %1028 = vperm.xlu1 %2864, %v181_v63  }
 0x517   :  { %1043 = vperm.xlu0 %2863, %v184_v6  }
 0x51a   :  { %1038 = vperm.xlu1 %2864, %v183_v7  }
 0x51b   :  { %1053 = vperm.xlu0 %2863, %v186_v62  }
 0x51e   :  { %1048 = vperm.xlu1 %2864, %v185_v23  }
 0x51f   :  { %1063 = vperm.xlu0 %2863, %v188_v8   ;;  %v1848_v8 = vsel %vm426_vm5, %v1845_v44, %v1847_v60 }
 0x522   :  { %1058 = vperm.xlu1 %2864, %v187_v9   ;;  %v1825_v9 = vsel %vm394_vm6, %v1822_v45, %v1824_v1 }
 0x523   :  { %1073 = vperm.xlu0 %2863, %v190_v3  }
 0x526   :  { %1068 = vperm.xlu1 %2864, %v189_v10   ;;  %v1803_v10 = vsel %vm354_vm4, %v1800_v43, %v1802_v40 }
 0x527   :  { %1083 = vperm.xlu0 %2863, %v192_v5  }
 0x52a   :  { %1078 = vperm.xlu1 %2864, %v191_v18  }
 0x52b   :  { %1093 = vperm.xlu0 %2863, %v194_v0  }
 0x52e   :  { %1088 = vperm.xlu1 %2864, %v193_v49   ;;  %v1849_v49 = vrot.slane %v1781_v59, 6 }
 0x52f   :  { %1103 = vperm.xlu0 %2863, %v196_v48  }
 0x532   :  { %1098 = vperm.xlu1 %2864, %v195_v30  }
 0x533   :  { %1132 = vperm.xlu0 %2863, %v198_v16  }
 0x536   :  { %1108 = vperm.xlu1 %2864, %v197_v13  }
 0x537   :  { %1142 = vperm.xlu0 %2863, %v200_v37  }
 0x53a   :  { %1137 = vperm.xlu1 %2864, %v199_v17  }
 0x53b   :  { %1152 = vperm.xlu0 %2863, %v202_v52  }
 0x53e   :  { %1147 = vperm.xlu1 %2864, %v201_v19  }
 0x53f   :  { %1162 = vperm.xlu0 %2863, %v204_v20  }
 0x542   :  { %1157 = vperm.xlu1 %2864, %v203_v21  }
 0x543   :  { %1172 = vperm.xlu0 %2863, %v206_v25  }
 0x546   :  { %1167 = vperm.xlu1 %2864, %v205_v14  }
 0x547   :  { %1182 = vperm.xlu0 %2863, %v208_v28  }
 0x54a   :  { %1177 = vperm.xlu1 %2864, %v207_v36   ;;  %v1010_v36 = vrot.slane %v4398_v61, 4 }
 0x54b   :  { %1192 = vperm.xlu0 %2863, %v210_v12  }
 0x54e   :  { %1187 = vperm.xlu1 %2864, %v209_v29  }
 0x54f   :  { %1202 = vperm.xlu0 %2863, %v212_v33   ;;  %v1011_v33 = vmax.f32 %v4398_v61, %v1010_v36 }
 0x552   :  { %1197 = vperm.xlu1 %2864, %v211_v31  }
 0x553   :  { %1212 = vperm.xlu0 %2863, %v214_v24  }
 0x556   :  { %1207 = vperm.xlu1 %2864, %v213_v32   ;;  %v1012_v32 = vrot.slane %v1011_v33, 2 }
 0x557   :  { %1222 = vperm.xlu0 %2863, %v216_v34  }
 0x558   :  { %v1013_v43 = vmax.f32 %v1011_v33, %v1012_v32 }
 0x55a   :  { %1217 = vperm.xlu1 %2864, %v215_v42   ;;  %v1014_v15 = vrot.slane %v1013_v43, 1 }
 0x55c   :  { %v4624_v61 = vmax.f32 %v1013_v43, %v1014_v15 }
 0x573   :  { %v2840_v22 = vpop.permute.xlu1 %2839  ;;  %v2835_v51 = vpop.permute.xlu0 %2834 }
 0x574   :  { %v2842_v47 = vunpack.i.h.bf16 %v2840_v22  ;;  %v2841_v50 = vunpack.i.l.bf16 %v2840_v22  ;;  %v2837_v41 = vunpack.i.h.bf16 %v2835_v51  ;;  %v2836_v54 = vunpack.i.l.bf16 %v2835_v51 }
 0x576   :  { %v1879_v58 = vsel %vm524_vm8, %v1846_v55, %v2841_v50  ;;  %v1876_v26 = vsel %vm524_vm8, %v1823_v56, %v2842_v47  ;;  %v1873_v35 = vsel %vm524_vm8, %v1801_v53, %v2836_v54  ;;  %v1870_v2 = vsel %vm524_vm8, %v4403_v11, %v2837_v41 }
 0x577   :  { %2026 = vmatprep.mubr.f32.mxu1 %v1879_v58  ;;  %1946 = vmatprep.mubr.f32.mxu0 %v1873_v35 }
 0x578   :  { %v2855_v4 = vpop.permute.xlu1 %2854  ;;  %2027 = vmatmul.mubr.f32.vlgmr.msra.gmra.mxu1 %v1876_v26  ;;  %1947 = vmatmul.mubr.f32.vlgmr.msra.gmra.mxu0 %v1870_v2 }
 0x579   :  { %v2857_v63 = vunpack.i.h.bf16 %v2855_v4  ;;  %v2856_v6 = vunpack.i.l.bf16 %v2855_v4  ;;  %v2845_v7 = vpop.permute.xlu0 %2844 }
 0x57a   :  { %v2847_v62 = vunpack.i.h.bf16 %v2845_v7  ;;  %v2846_v23 = vunpack.i.l.bf16 %v2845_v7 }
 0x57b   :  { %v1880_v3 = vsel %vm524_vm8, %v1848_v8, %v2856_v6  ;;  %v1877_v11 = vsel %vm524_vm8, %v1825_v9, %v2857_v63 }
 0x57c   :  { %2031 = vmatprep.mubr.f32.mxu1 %v1880_v3  ;;  %v1874_v5 = vsel %vm524_vm8, %v1803_v10, %v2846_v23  ;;  %v1871_v18 = vsel %vm524_vm8, %v4405_v38, %v2847_v62  ;;  %v1850_v38 = vsel %vm426_vm5, %v1847_v60, %v1849_v49 }
 0x57d   :  { %v2850_v0 = vpop.permute.xlu0 %2849  ;;  %1951 = vmatprep.mubr.f32.mxu0 %v1874_v5  ;;  %2032 = vmatmul.mubr.f32.gmra.mxu1 %v1877_v11 }
 0x57e   :  { %v2852_v48 = vunpack.i.h.bf16 %v2850_v0  ;;  %v2851_v30 = vunpack.i.l.bf16 %v2850_v0  ;;  %1952 = vmatmul.mubr.f32.gmra.mxu0 %v1871_v18 }
 0x580   :  { %v2860_v16 = vpop.permute.xlu1 %2859  ;;  %v1875_v13 = vsel %vm524_vm8, %v1802_v40, %v2851_v30  ;;  %v1872_v37 = vsel %vm524_vm8, %v4418_v39, %v2852_v48 }
 0x581   :  { %v2862_v17 = vunpack.i.h.bf16 %v2860_v16  ;;  %v2861_v52 = vunpack.i.l.bf16 %v2860_v16  ;;  %1956 = vmatprep.mubr.f32.mxu0 %v1875_v13 }
 0x582   :  { %1957 = vmatmul.mubr.f32.gmra.mxu0 %v1872_v37 }
 0x583   :  { %v1881_v19 = vsel %vm524_vm8, %v1850_v38, %v2861_v52  ;;  %v1878_v57 = vsel %vm524_vm8, %v1824_v1, %v2862_v17 }
 0x584   :  { %2036 = vmatprep.mubr.f32.mxu1 %v1881_v19 }
 0x585   :  { %2037 = vmatmul.mubr.f32.gmra.mxu1 %v1878_v57 }
 0x58a   :  { %v4588_v59 = vpop.permute.xlu0 %1018 }
 0x58b   :  { %v1111_v46 = vmul.f32 %v4588_v59, %v4624_v61 }
 0x58d   :  { %v4590_v20 = vpop.permute.xlu1 %1023 }
 0x58e   :  { %v4592_v21 = vpop.permute.xlu0 %1033  ;;  %v1112_v58 = vmul.f32 %v4590_v20, %v4624_v61 }
 0x58f   :  { %v1114_v4 = vmul.f32 %v4592_v21, %v4624_v61 }
 0x591   :  { %v4594_v25 = vpop.permute.xlu1 %1028 }
 0x592   :  { %v4596_v39 = vpop.permute.xlu0 %1043  ;;  %v1113_v53 = vmul.f32 %v4594_v25, %v4624_v61 }
 0x593   :  { %v1116_v3 = vmul.f32 %v4596_v39, %v4624_v61 }
 0x595   :  { %v4598_v14 = vpop.permute.xlu1 %1038 }
 0x596   :  { %v4600_v28 = vpop.permute.xlu0 %1053  ;;  %v1115_v26 = vmul.f32 %v4598_v14, %v4624_v61 }
 0x597   :  { %v1118_v30 = vmul.f32 %v4600_v28, %v4624_v61 }
 0x599   :  { %v4603_v12 = vpop.permute.xlu1 %1048 }
 0x59a   :  { %v4605_v29 = vpop.permute.xlu0 %1063  ;;  %v1117_v6 = vmul.f32 %v4603_v12, %v4624_v61 }
 0x59b   :  { %v1120_v57 = vmul.f32 %v4605_v29, %v4624_v61 }
 0x59d   :  { %v4608_v31 = vpop.permute.xlu1 %1058 }
 0x59e   :  { %v4610_v24 = vpop.permute.xlu0 %1073  ;;  %v1119_v11 = vmul.f32 %v4608_v31, %v4624_v61 }
 0x5a1   :  { %v4612_v34 = vpop.permute.xlu1 %1068 }
 0x5a2   :  { %v4614_v42 = vpop.permute.xlu0 %1083  ;;  %v1121_v13 = vmul.f32 %v4612_v34, %v4624_v61 }
 0x5a5   :  { %v4616_v44 = vpop.permute.xlu1 %1078 }
 0x5a6   :  { %v4618_v45 = vpop.permute.xlu0 %1093  ;;  %v1123_v33 = vmul.f32 %v4616_v44, %v4624_v61 }
 0x5a9   :  { %v4620_v22 = vpop.permute.xlu1 %1088 }
 0x5aa   :  { %v4622_v27 = vpop.permute.xlu0 %1103 }
 0x5ad   :  { %v4628_v47 = vpop.permute.xlu1 %1098 }
 0x5ae   :  { %v4630_v50 = vpop.permute.xlu0 %1132 }
 0x5af   :  { %v1225_v51 = vadd.f32 %v4630_v50, %v1111_v46 }
 0x5b1   :  { %v1244_v41 = vmax.f32 %v1225_v51, 0.0  ;;  %v4635_v54 = vpop.permute.xlu1 %1108 }
 0x5b2   :  { %v4637_v55 = vpop.permute.xlu0 %1142 }
 0x5b3   :  { %1263 = vst [vmem:[%s4890_s9] sm:$0xff] %v1244_v41  ;;  %v1227_v56 = vadd.f32 %v4637_v55, %v1113_v53  ;;  %v1122_v53 = vmul.f32 %v4610_v24, %v4624_v61 }
 0x5b5   :  { %v1246_v60 = vmax.f32 %v1227_v56, 0.0  ;;  %v4647_v1 = vpop.permute.xlu1 %1137  ;;  %v1125_v56 = vmul.f32 %v4620_v22, %v4624_v61 }
 0x5b6   :  { %v1226_v35 = vadd.f32 %v4647_v1, %v1112_v58  ;;  %v4650_v2 = vpop.permute.xlu0 %1152 }
 0x5b7   :  { %1265 = vst [vmem:[%s4890_s9 + $0x10] sm:$0xff] %v1246_v60  ;;  %v1229_v40 = vadd.f32 %v4650_v2, %v1115_v26 }
 0x5b8   :  { %v1245_v63 = vmax.f32 %v1226_v35, 0.0 }
 0x5b9   :  { %v1248_v7 = vmax.f32 %v1229_v40, 0.0  ;;  %v4660_v62 = vpop.permute.xlu1 %1147 }
 0x5ba   :  { %1264 = vst [vmem:[%s4890_s9 + $0x8] sm:$0xff] %v1245_v63  ;;  %v1228_v23 = vadd.f32 %v4660_v62, %v1114_v4  ;;  %v4666_v8 = vpop.permute.xlu0 %1162  ;;  %v1124_v4 = vmul.f32 %v4614_v42, %v4624_v61 }
 0x5bb   :  { %1267 = vst [vmem:[%s4890_s9 + $0x20] sm:$0xff] %v1248_v7  ;;  %v1231_v9 = vadd.f32 %v4666_v8, %v1117_v6  ;;  %v1127_v6 = vmul.f32 %v4628_v47, %v4624_v61 }
 0x5bc   :  { %v1247_v10 = vmax.f32 %v1228_v23, 0.0 }
 0x5bd   :  { %v1250_v5 = vmax.f32 %v1231_v9, 0.0  ;;  %v4676_v18 = vpop.permute.xlu1 %1157 }
 0x5be   :  { %1266 = vst [vmem:[%s4890_s9 + $0x18] sm:$0xff] %v1247_v10  ;;  %v1230_v0 = vadd.f32 %v4676_v18, %v1116_v3  ;;  %v4682_v49 = vpop.permute.xlu0 %1172 }
 0x5bf   :  { %1269 = vst [vmem:[%s4890_s9 + $0x30] sm:$0xff] %v1250_v5  ;;  %v1233_v48 = vadd.f32 %v4682_v49, %v1119_v11  ;;  %v1126_v11 = vmul.f32 %v4618_v45, %v4624_v61 }
 0x5c0   :  { %v1249_v16 = vmax.f32 %v1230_v0, 0.0  ;;  %v1129_v0 = vmul.f32 %v4635_v54, %v4624_v61 }
 0x5c1   :  { %v1252_v37 = vmax.f32 %v1233_v48, 0.0  ;;  %v4692_v17 = vpop.permute.xlu1 %1167 }
 0x5c2   :  { %1268 = vst [vmem:[%s4890_s9 + $0x28] sm:$0xff] %v1249_v16  ;;  %v1232_v52 = vadd.f32 %v4692_v17, %v1118_v30  ;;  %v4698_v38 = vpop.permute.xlu0 %1182 }
 0x5c3   :  { %1271 = vst [vmem:[%s4890_s9 + $0x40] sm:$0xff] %v1252_v37  ;;  %v1235_v19 = vadd.f32 %v4698_v38, %v1121_v13 }
 0x5c4   :  { %v1251_v36 = vmax.f32 %v1232_v52, 0.0  ;;  %v1128_v52 = vmul.f32 %v4622_v27, %v4624_v61 }
 0x5c5   :  { %v1254_v32 = vmax.f32 %v1235_v19, 0.0  ;;  %v4708_v43 = vpop.permute.xlu1 %1177 }
 0x5c6   :  { %1270 = vst [vmem:[%s4890_s9 + $0x38] sm:$0xff] %v1251_v36  ;;  %v1234_v15 = vadd.f32 %v4708_v43, %v1120_v57  ;;  %v4714_v46 = vpop.permute.xlu0 %1192 }
 0x5c7   :  { %1273 = vst [vmem:[%s4890_s9 + $0x50] sm:$0xff] %v1254_v32  ;;  %v1237_v51 = vadd.f32 %v4714_v46, %v1123_v33 }
 0x5c8   :  { %v1253_v41 = vmax.f32 %v1234_v15, 0.0 }
 0x5c9   :  { %v1256_v58 = vmax.f32 %v1237_v51, 0.0  ;;  %v4724_v26 = vpop.permute.xlu1 %1187 }
 0x5ca   :  { %1272 = vst [vmem:[%s4890_s9 + $0x48] sm:$0xff] %v1253_v41  ;;  %v1236_v60 = vadd.f32 %v4724_v26, %v1122_v53  ;;  %v4730_v35 = vpop.permute.xlu0 %1202 }
 0x5cb   :  { %1275 = vst [vmem:[%s4890_s9 + $0x60] sm:$0xff] %v1256_v58  ;;  %v1239_v40 = vadd.f32 %v4730_v35, %v1125_v56 }
 0x5cc   :  { %v1255_v63 = vmax.f32 %v1236_v60, 0.0 }
 0x5cd   :  { %v1258_v7 = vmax.f32 %v1239_v40, 0.0  ;;  %v4740_v23 = vpop.permute.xlu1 %1197 }
 0x5ce   :  { %1274 = vst [vmem:[%s4890_s9 + $0x58] sm:$0xff] %v1255_v63  ;;  %v1238_v9 = vadd.f32 %v4740_v23, %v1124_v4  ;;  %v4746_v3 = vpop.permute.xlu0 %1212 }
 0x5cf   :  { %1277 = vst [vmem:[%s4890_s9 + $0x70] sm:$0xff] %v1258_v7  ;;  %v1241_v10 = vadd.f32 %v4746_v3, %v1127_v6  ;;  %v3009_v6 = vld [vmem:[%s4887_s6] ss:$0 sm:$0xff] }
 0x5d0   :  { %v1257_v5 = vmax.f32 %v1238_v9, 0.0 }
 0x5d1   :  { %v1260_v48 = vmax.f32 %v1241_v10, 0.0  ;;  %v4756_v30 = vpop.permute.xlu1 %1207 }
 0x5d2   :  { %1276 = vst [vmem:[%s4890_s9 + $0x68] sm:$0xff] %v1257_v5  ;;  %v1240_v16 = vadd.f32 %v4756_v30, %v1126_v11  ;;  %v4762_v13 = vpop.permute.xlu0 %1222 }
 0x5d3   :  { %4892 = vst [vmem:[#allocation2_spill] sm:$0xff] %v4762_v13  ;;  %1279 = vst [vmem:[%s4890_s9 + $0x80] sm:$0xff] %v1260_v48  ;;  %v1243_v37 = vadd.f32 %v4762_v13, %v1129_v0 }
 0x5d4   :  { %v1259_v19 = vmax.f32 %v1240_v16, 0.0 }
 0x5d5   :  { %v1262_v57 = vmax.f32 %v1243_v37, 0.0  ;;  %v4770_v36 = vpop.permute.xlu1 %1217 }
 0x5d6   :  { %1278 = vst [vmem:[%s4890_s9 + $0x78] sm:$0xff] %v1259_v19  ;;  %v1242_v33 = vadd.f32 %v4770_v36, %v1128_v52 }
 0x5d7   :  { %1281 = vst [vmem:[%s4890_s9 + $0x90] sm:$0x3f] %v1262_v57 }
 0x5d8   :  { %v1261_v32 = vmax.f32 %v1242_v33, 0.0 }
 0x5da   :  { %1280 = vst [vmem:[%s4890_s9 + $0x88] sm:$0xff] %v1261_v32 }
 0x638   :  { %v2538_v61 = vpop.f32.mrf.mxu1  ;;  %v2497_v15 = vpop.f32.mrf.mxu0 }
 0x63a   :  { %v2539_v51 = vpop.f32.mrf.mxu1  ;;  %v2498_v53 = vpop.f32.mrf.mxu0 }
 0x63b   :  { %v2499_v58 = vadd.f32 %v2498_v53, %v2497_v15  ;;  %v2540_v5 = vadd.f32 %v2539_v51, %v2538_v61 }
 0x63d   :  { %v2541_v41 = vpop.f32.mrf.mxu1  ;;  %v1949_v7 = vadd.f32 %v3009_v6, %v2499_v58 }
 0x63e   :  { %v2500_v56 = vpop.f32.mrf.mxu0 }
 0x63f   :  { %v2542_v40 = vpop.f32.mrf.mxu1  ;;  %v2029_v37 = vadd.f32 %v2540_v5, %v1949_v7 }
 0x640   :  { %v2501_v60 = vpop.f32.mrf.mxu0  ;;  %v2543_v10 = vadd.f32 %v2542_v40, %v2541_v41 }
 0x641   :  { %v2502_v4 = vadd.f32 %v2501_v60, %v2500_v56  ;;  %v2042_v15 = vmax.f32 %v2029_v37, 0.0 }
 0x642   :  { %v2503_v63 = vpop.f32.mrf.mxu0 }
 0x643   :  { %v1954_v9 = vadd.f32 %v3009_v6, %v2502_v4 }
 0x644   :  { %v2504_v11 = vpop.f32.mrf.mxu0 }
 0x645   :  { %v2034_v0 = vadd.f32 %v2543_v10, %v1954_v9  ;;  %v2505_v48 = vadd.f32 %v2504_v11, %v2503_v63  ;;  %v2544_v16 = vpop.f32.mrf.mxu1 }
 0x647   :  { %v2545_v52 = vpop.f32.mrf.mxu1  ;;  %v1959_v19 = vadd.f32 %v3009_v6, %v2505_v48  ;;  %v2043_v33 = vmax.f32 %v2034_v0, 0.0 }
 0x648   :  { %v2546_v57 = vadd.f32 %v2545_v52, %v2544_v16  ;;  %v4893_v16 = vld [vmem:[#allocation2_spill] sm:$0xff] }
 0x649   :  { %v2046_v56 = vmax.f32 %v2042_v15, %v2043_v33 }
 0x64a   :  { %v2039_v32 = vadd.f32 %v2546_v57, %v1959_v19 }
 0x64c   :  { %v2044_v53 = vmax.f32 %v2039_v32, 0.0 }
 0x64e   :  { %v2045_v60 = vsel %vm406_vm3, %v2044_v53, -inf }
 0x64f   :  { %v2047_v13 = vmax.f32 %v2046_v56, %v2045_v60 }
 0x651   :  { %v2048_v58 = vrot.slane %v2047_v13, 4 }
 0x653   :  { %v2049_v4 = vmax.f32 %v2047_v13, %v2048_v58 }
 0x655   :  { %v2050_v41 = vrot.slane %v2049_v4, 2 }
 0x657   :  { %v2051_v40 = vmax.f32 %v2049_v4, %v2050_v41 }
 0x659   :  { %v2052_v61 = vrot.slane %v2051_v40, 1 }
 0x65b   :  { %v2053_v51 = vmax.f32 %v2051_v40, %v2052_v61 }
 0x65d   :  { %v2054_v63 = vmul.f32 %v2053_v51, %v4588_v59  ;;  %v2055_v7 = vmul.f32 %v2053_v51, %v4590_v20  ;;  %v2056_v6 = vmul.f32 %v2053_v51, %v4594_v25  ;;  %v2057_v9 = vmul.f32 %v2053_v51, %v4592_v21 }
 0x65e   :  { %v2058_v10 = vmul.f32 %v2053_v51, %v4598_v14  ;;  %v2059_v11 = vmul.f32 %v2053_v51, %v4596_v39  ;;  %v2060_v5 = vmul.f32 %v2053_v51, %v4603_v12  ;;  %v2061_v13 = vmul.f32 %v2053_v51, %v4600_v28 }
 0x65f   :  { %v2062_v0 = vmul.f32 %v2053_v51, %v4608_v31  ;;  %v2063_v48 = vmul.f32 %v2053_v51, %v4605_v29  ;;  %v2064_v59 = vmul.f32 %v2053_v51, %v4612_v34  ;;  %v2065_v20 = vmul.f32 %v2053_v51, %v4610_v24 }
 0x660   :  { %v2066_v25 = vmul.f32 %v2053_v51, %v4616_v44  ;;  %v2067_v21 = vmul.f32 %v2053_v51, %v4614_v42  ;;  %v2068_v14 = vmul.f32 %v2053_v51, %v4620_v22  ;;  %v2069_v39 = vmul.f32 %v2053_v51, %v4618_v45 }
 0x661   :  { %v2070_v12 = vmul.f32 %v2053_v51, %v4628_v47  ;;  %v2071_v28 = vmul.f32 %v2053_v51, %v4622_v27  ;;  %v2072_v31 = vmul.f32 %v2053_v51, %v4635_v54  ;;  %v2073_v29 = vadd.f32 %v2054_v63, %v4630_v50 }
 0x662   :  { %v2074_v34 = vadd.f32 %v2055_v7, %v4647_v1  ;;  %v2075_v24 = vadd.f32 %v2056_v6, %v4637_v55  ;;  %v2076_v44 = vadd.f32 %v2057_v9, %v4660_v62  ;;  %v2077_v42 = vadd.f32 %v2058_v10, %v4650_v2 }
 0x663   :  { %v2078_v22 = vadd.f32 %v2059_v11, %v4676_v18  ;;  %v2079_v45 = vadd.f32 %v2060_v5, %v4666_v8  ;;  %v2080_v47 = vadd.f32 %v2061_v13, %v4692_v17  ;;  %v2081_v27 = vadd.f32 %v2062_v0, %v4682_v49 }
 0x664   :  { %v2082_v54 = vadd.f32 %v2063_v48, %v4708_v43  ;;  %v2083_v50 = vadd.f32 %v2064_v59, %v4698_v38  ;;  %v2084_v1 = vadd.f32 %v2065_v20, %v4724_v26  ;;  %v2085_v55 = vadd.f32 %v2066_v25, %v4714_v46 }
 0x665   :  { %v2086_v62 = vadd.f32 %v2067_v21, %v4740_v23  ;;  %v2087_v2 = vadd.f32 %v2068_v14, %v4730_v35  ;;  %v2088_v18 = vadd.f32 %v2069_v39, %v4756_v30  ;;  %v2089_v8 = vadd.f32 %v2070_v12, %v4746_v3 }
 0x666   :  { %v2090_v17 = vadd.f32 %v2071_v28, %v4770_v36  ;;  %v2091_v49 = vadd.f32 %v2072_v31, %v4893_v16  ;;  %v2092_v37 = vmax.f32 %v2073_v29, 0.0  ;;  %v2093_v43 = vmax.f32 %v2074_v34, 0.0 }
 0x667   :  { %v2094_v52 = vmax.f32 %v2075_v24, 0.0  ;;  %v2095_v38 = vmax.f32 %v2076_v44, 0.0  ;;  %v2096_v19 = vmax.f32 %v2077_v42, 0.0  ;;  %v2097_v26 = vmax.f32 %v2078_v22, 0.0 }
 0x668   :  { %v2098_v57 = vmax.f32 %v2079_v45, 0.0  ;;  %v2099_v46 = vmax.f32 %v2080_v47, 0.0  ;;  %v2100_v33 = vmax.f32 %v2081_v27, 0.0  ;;  %v2101_v23 = vmax.f32 %v2082_v54, 0.0  ;;  %2144 = vst [vmem:[%s4890_s9 + $0x98] sm:$0xff] %v2092_v37  ;;  %2145 = vst [vmem:[%s4890_s9 + $0xa0] sm:$0xff] %v2093_v43 }
 0x669   :  { %v2102_v35 = vmax.f32 %v2083_v50, 0.0  ;;  %v2103_v3 = vmax.f32 %v2084_v1, 0.0  ;;  %v2104_v30 = vmax.f32 %v2085_v55, 0.0  ;;  %v2105_v36 = vmax.f32 %v2086_v62, 0.0  ;;  %2146 = vst [vmem:[%s4890_s9 + $0xa8] sm:$0xff] %v2094_v52  ;;  %2147 = vst [vmem:[%s4890_s9 + $0xb0] sm:$0xff] %v2095_v38 }
 0x66a   :  { %2148 = vst [vmem:[%s4890_s9 + $0xb8] sm:$0xff] %v2096_v19  ;;  %2149 = vst [vmem:[%s4890_s9 + $0xc0] sm:$0xff] %v2097_v26  ;;  %v2106_v32 = vmax.f32 %v2087_v2, 0.0  ;;  %v2107_v15 = vmax.f32 %v2088_v18, 0.0  ;;  %v2108_v53 = vmax.f32 %v2089_v8, 0.0  ;;  %v2109_v56 = vmax.f32 %v2090_v17, 0.0 }
 0x66b   :  { %2150 = vst [vmem:[%s4890_s9 + $0xc8] sm:$0xff] %v2098_v57  ;;  %2151 = vst [vmem:[%s4890_s9 + $0xd0] sm:$0xff] %v2099_v46  ;;  %v2110_v60 = vmax.f32 %v2091_v49, 0.0 }
 0x66c   :  { %2152 = vst [vmem:[%s4890_s9 + $0xd8] sm:$0xff] %v2100_v33  ;;  %2153 = vst [vmem:[%s4890_s9 + $0xe0] sm:$0xff] %v2101_v23 }
 0x66d   :  { %2154 = vst [vmem:[%s4890_s9 + $0xe8] sm:$0xff] %v2102_v35  ;;  %2155 = vst [vmem:[%s4890_s9 + $0xf0] sm:$0xff] %v2103_v3 }
 0x66e   :  { %2156 = vst [vmem:[%s4890_s9 + $0xf8] sm:$0xff] %v2104_v30  ;;  %2157 = vst [vmem:[%s4890_s9 + $0x100] sm:$0xff] %v2105_v36 }
 0x66f   :  { %2158 = vst [vmem:[%s4890_s9 + $0x108] sm:$0xff] %v2106_v32  ;;  %2159 = vst [vmem:[%s4890_s9 + $0x110] sm:$0xff] %v2107_v15 }
 0x670   :  { %2160 = vst [vmem:[%s4890_s9 + $0x118] sm:$0xff] %v2108_v53  ;;  %2161 = vst [vmem:[%s4890_s9 + $0x120] sm:$0xff] %v2109_v56 }
 0x671   :  { %2162 = vst [vmem:[%s4890_s9 + $0x128] sm:$0x3f] %v2110_v60 }

</bundles_post_ra>
